<compile_context>
chip_gen: v7x
topology: tpu7x:2x2x1
jax: 0.10.0
libtpu: 0.0.40
codegen_flags: <defaults>
</compile_context>

<pallas_src>
import jax
import jax.numpy as jnp
from jax.experimental import pallas as pl
from jax.experimental.pallas import tpu as pltpu

# ---- args (mirror the module's __init__) ----
NUM_UNITS = 32           # args.num_units  (H)
NUM_DECODER_LAYERS = 2   # args.num_decoder_layers (L)
DECODER_DROPOUT = 0.0    # args.decoder_dropout -> identity
NUM_PLACEHOLDERS = 6     # args.num_placeholders
VOCAB_SIZE = 10
V = VOCAB_SIZE + NUM_PLACEHOLDERS   # output vocab = 16
B = 2                    # batch
T = 8                    # sequence length (outputs.size(1))
H = NUM_UNITS
L = NUM_DECODER_LAYERS


# --------------------------------------------------------------------------
# Fused kernel: embed lookup -> stacked GRU over all T steps -> output head.
# Everything lives in VMEM for the whole (single) invocation.
# Row layout is batch-major: row b*T + t  <->  (batch b, time t).
# --------------------------------------------------------------------------
def decoder_fwd_kernel(ids_ref, h0_ref, emb_tbl_ref, wih_ref, whh_ref,
                       bi_ref, bhn_ref, wout_ref,
                       logits_ref, embed_ref):
    # ---- embedding lookup via one-hot matmul (no gather) ----
    ids = ids_ref[...]                                              # (B*T, 1) int32, batch-major
    iota = jax.lax.broadcasted_iota(jnp.int32, (B * T, V), 1)
    onehot = jnp.where(iota == ids, 1.0, 0.0).astype(jnp.float32)   # (B*T, V)
    x = jnp.dot(onehot, emb_tbl_ref[...],
                preferred_element_type=jnp.float32)                 # (B*T, H)
    embed_ref[...] = x                                              # F.dropout(embed, 0.0) == id

    h0 = h0_ref[...]                                                # (B, H) encoder hidden

    # ---- stacked GRU: layer-by-layer scan over the full sequence ----
    for l in range(L):
        # Input-side gates for all timesteps at once, ONE packed matmul
        # (r/z hh-biases are pre-folded into bi; only b_hn stays separate
        # because it sits inside r * (.)).
        gi = jnp.dot(x, wih_ref[l],
                     preferred_element_type=jnp.float32) + bi_ref[l]   # (B*T, 3H)
        gi3 = gi.reshape(B, T, 3 * H)                                  # layout-free reshape

        w_hh = whh_ref[l]                                              # (H, 3H) packed r|z|n
        b_hn = bhn_ref[l]                                              # (1, H)

        h = h0                                                         # each layer starts at h0
        hs = []
        for t in range(T):                                             # unrolled, T = 8
            gh = jnp.dot(h, w_hh,
                         preferred_element_type=jnp.float32)           # (B, 3H) — 1 MXU op/step
            gi_t = gi3[:, t, :]                                        # (B, 3H)
            r = jax.nn.sigmoid(gi_t[:, 0:H] + gh[:, 0:H])
            z = jax.nn.sigmoid(gi_t[:, H:2 * H] + gh[:, H:2 * H])
            n = jnp.tanh(gi_t[:, 2 * H:3 * H] + r * (gh[:, 2 * H:3 * H] + b_hn))
            h = n + z * (h - n)                                        # == (1-z)*n + z*h
            hs.append(h)

        # inter-layer dropout p=0.0 -> identity.  Reassemble batch-major rows
        # (b*T + t) without any VMEM scratch round trip.
        x = jnp.stack(hs, axis=1).reshape(B * T, H)                    # (B*T, H)

    # ---- output head: self.out(preds) == preds @ W_out^T (no bias) ----
    logits_ref[...] = jnp.dot(x, wout_ref[...],
                              preferred_element_type=jnp.float32)      # (B*T, V)


def decoder_forward_call(ids_bm, hidden0, emb_tbl, wih_p, whh_p, bi_p, bhn, w_out_t):
    vmem = pl.BlockSpec(memory_space=pltpu.MemorySpace.VMEM)        # whole array, resident in VMEM
    return pl.pallas_call(
        decoder_fwd_kernel,
        out_shape=(jax.ShapeDtypeStruct((B * T, V), jnp.float32),   # logits (batch-major rows)
                   jax.ShapeDtypeStruct((B * T, H), jnp.float32)),  # embed  (batch-major rows)
        in_specs=[vmem] * 8,
        out_specs=(vmem, vmem),
    )(ids_bm, hidden0, emb_tbl, wih_p, whh_p, bi_p, bhn, w_out_t)


# --------------------------------------------------------------------------
# One-time parameter packing (outside the jitted forward path):
#   * gates lane-concatenated (r|z|n): W_* -> (L, H, 3H)
#   * hh-bias of r/z folded into the input-side bias (exactly equivalent);
#     b_hn kept separate (it sits inside r*(.)).
# --------------------------------------------------------------------------
def pack_params(params):
    wih, whh = params["wih"], params["whh"]              # (L, 3, H, H)
    bih, bhh = params["bih"], params["bhh"]              # (L, 3, H)
    wih_p = jnp.concatenate([wih[:, 0], wih[:, 1], wih[:, 2]], axis=-1)   # (L, H, 3H)
    whh_p = jnp.concatenate([whh[:, 0], whh[:, 1], whh[:, 2]], axis=-1)   # (L, H, 3H)
    bi_p = jnp.concatenate([bih[:, 0] + bhh[:, 0],
                            bih[:, 1] + bhh[:, 1],
                            bih[:, 2]], axis=-1).reshape(L, 1, 3 * H)     # (L, 1, 3H)
    bhn = bhh[:, 2].reshape(L, 1, H)                                      # (L, 1, H)
    return {"embed": params["embed"], "wih_p": wih_p, "whh_p": whh_p,
            "bi_p": bi_p, "bhn": bhn, "w_out_t": params["w_out_t"]}


# --------------------------------------------------------------------------
# Forward pass (mirrors BaseSeqDecoderAttn.forward)
# --------------------------------------------------------------------------
def forward(packed, hidden, memory, outputs):
    # memory is untouched: base-class update_memory is identity and the
    # attention step is abstract.  F.dropout(p=0.0) calls are identities.
    _ = memory

    # Batch-major flat ids: row b*T + t == outputs[b, t]  (free reshape).
    ids_bm = outputs.reshape(B * T, 1).astype(jnp.int32)

    logits_flat, embed_flat = decoder_forward_call(
        ids_bm, hidden.astype(jnp.float32), packed["embed"],
        packed["wih_p"], packed["whh_p"], packed["bi_p"], packed["bhn"],
        packed["w_out_t"])

    # Batch-major rows -> plain reshapes, no transposes.
    return logits_flat.reshape(B, T, V), embed_flat.reshape(B, T, H)


# --------------------------------------------------------------------------
# Pure-JAX reference (PyTorch loop order: time outer, layers inner).
# Weight layout: wih/whh[l, g] is (H_in, H) with gate order (r, z, n);
# this equals torch GRUCell weight_ih[g*H:(g+1)*H, :].T etc.
# --------------------------------------------------------------------------
def forward_ref(params, hidden0, outputs):
    emb = jnp.take(params["embed"], outputs, axis=0)                # (B, T, H)
    wih, whh, bih, bhh = params["wih"], params["whh"], params["bih"], params["bhh"]
    h = [hidden0 for _ in range(L)]
    preds = []
    for t in range(T):
        x = emb[:, t]
        for l in range(L):
            gi_r = x @ wih[l, 0] + bih[l, 0]
            gi_z = x @ wih[l, 1] + bih[l, 1]
            gi_n = x @ wih[l, 2] + bih[l, 2]
            gh_r = h[l] @ whh[l, 0] + bhh[l, 0]
            gh_z = h[l] @ whh[l, 1] + bhh[l, 1]
            gh_n = h[l] @ whh[l, 2] + bhh[l, 2]
            r = jax.nn.sigmoid(gi_r + gh_r)
            z = jax.nn.sigmoid(gi_z + gh_z)
            n = jnp.tanh(gi_n + r * gh_n)
            hn = (1.0 - z) * n + z * h[l]
            h[l] = hn
            x = hn
        preds.append(x)
    preds = jnp.stack(preds, axis=1)                                # (B, T, H)
    logits = preds @ params["w_out_t"]                              # (B, T, V)
    return logits, emb


if __name__ == "__main__":
    key = jax.random.PRNGKey(0)
    ks = jax.random.split(key, 9)

    # Deterministic synthetic parameters (shapes imply the module __init__).
    params = {
        # nn.Embedding(vocab + placeholders, num_units)
        "embed": 0.1 * jax.random.normal(ks[0], (V, H), jnp.float32),
        # StackedGRU / GRUCell weights, gate order (r, z, n), each (H_in, H)
        "wih": 0.1 * jax.random.normal(ks[1], (L, 3, H, H), jnp.float32),
        "whh": 0.1 * jax.random.normal(ks[2], (L, 3, H, H), jnp.float32),
        "bih": 0.1 * jax.random.normal(ks[3], (L, 3, H), jnp.float32),
        "bhh": 0.1 * jax.random.normal(ks[4], (L, 3, H), jnp.float32),
        # nn.Linear(num_units, vocab + placeholders, bias=False).weight.T -> (H, V)
        "w_out_t": 0.1 * jax.random.normal(ks[5], (H, V), jnp.float32),
    }
    packed = jax.tree_util.tree_map(jax.block_until_ready, pack_params(params))  # one-time prep

    hidden = jax.random.normal(ks[6], (B, H), jnp.float32)          # encoder hidden
    memory = (jax.random.normal(ks[7], (B, 5, H), jnp.float32),     # unused (abstract attention)
              jnp.full((B,), 5, jnp.int32))
    outputs = jax.random.randint(ks[8], (B, T), 0, V, jnp.int32)

    fwd = jax.jit(forward)
    logits, embed = fwd(packed, hidden, memory, outputs)
    logits = jax.block_until_ready(logits)
    embed = jax.block_until_ready(embed)

    assert logits.shape == (B, T, V) and embed.shape == (B, T, H)

    logits_ref, embed_ref = forward_ref(params, hidden, outputs)
    assert jnp.allclose(embed, embed_ref, atol=1e-4, rtol=1e-4), "embed mismatch"
    assert jnp.allclose(logits, logits_ref, atol=1e-4, rtol=1e-4), "logits mismatch"

    print("KERNEL_OK")
</pallas_src>

<mosaic_0001>
module attributes {stable_mosaic.version = 11 : i64} {
  func.func @decoder_fwd_kernel(%arg0: memref<16x1xi32, #tpu.memory_space<vmem>>, %arg1: memref<2x32xf32, #tpu.memory_space<vmem>>, %arg2: memref<16x32xf32, #tpu.memory_space<vmem>>, %arg3: memref<2x32x96xf32, #tpu.memory_space<vmem>>, %arg4: memref<2x32x96xf32, #tpu.memory_space<vmem>>, %arg5: memref<2x1x96xf32, #tpu.memory_space<vmem>>, %arg6: memref<2x1x32xf32, #tpu.memory_space<vmem>>, %arg7: memref<32x16xf32, #tpu.memory_space<vmem>>, %arg8: memref<16x16xf32, #tpu.memory_space<vmem>>, %arg9: memref<16x32xf32, #tpu.memory_space<vmem>>) attributes {dimension_semantics = [], scalar_prefetch = 0 : i64, scratch_operands = 0 : i64, tpu.core_type = #tpu.core_type<tc>} {
    %c0 = arith.constant 0 : index
    %c0_0 = arith.constant 0 : index
    %0 = vector.load %arg0[%c0, %c0_0] : memref<16x1xi32, #tpu.memory_space<vmem>>, vector<16x1xi32>
    %1 = tpu.iota {dimensions = array<i32: 1>} : vector<16x16xi32>
    %2 = vector.broadcast %0 : vector<16x1xi32> to vector<16x16xi32>
    %3 = arith.cmpi eq, %1, %2 : vector<16x16xi32>
    %cst = arith.constant 1.000000e+00 : f32
    %cst_1 = arith.constant 0.000000e+00 : f32
    %4 = vector.broadcast %cst : f32 to vector<16x16xf32>
    %5 = vector.broadcast %cst_1 : f32 to vector<16x16xf32>
    %6 = arith.select %3, %4, %5 : vector<16x16xi1>, vector<16x16xf32>
    %c0_2 = arith.constant 0 : index
    %c0_3 = arith.constant 0 : index
    %7 = vector.load %arg2[%c0_2, %c0_3] : memref<16x32xf32, #tpu.memory_space<vmem>>, vector<16x32xf32>
    %cst_4 = arith.constant dense<0.000000e+00> : vector<16x32xf32>
    %8 = tpu.matmul %6, %7, %cst_4 {dimension_numbers = #tpu.dot_dimension_numbers<[1], [0], [0], [1], [0, 0, 1, 1], [], []>} : vector<16x16xf32>, vector<16x32xf32>, vector<16x32xf32> -> vector<16x32xf32>
    %c0_5 = arith.constant 0 : index
    %c0_6 = arith.constant 0 : index
    %9 = vector.load %arg9[%c0_5, %c0_6] : memref<16x32xf32, #tpu.memory_space<vmem>>, vector<16x32xf32>
    tpu.vector_store %arg9[%c0_5, %c0_6], %8 {strides = array<i32>} : memref<16x32xf32, #tpu.memory_space<vmem>>, vector<16x32xf32>,
    %c0_7 = arith.constant 0 : index
    %c0_8 = arith.constant 0 : index
    %10 = vector.load %arg1[%c0_7, %c0_8] : memref<2x32xf32, #tpu.memory_space<vmem>>, vector<2x32xf32>
    %c0_9 = arith.constant 0 : index
    %c0_10 = arith.constant 0 : index
    %c0_11 = arith.constant 0 : index
    %11 = vector.load %arg3[%c0_9, %c0_10, %c0_11] : memref<2x32x96xf32, #tpu.memory_space<vmem>>, vector<1x32x96xf32>
    %12 = vector.shape_cast %11 : vector<1x32x96xf32> to vector<32x96xf32>
    %cst_12 = arith.constant dense<0.000000e+00> : vector<16x96xf32>
    %13 = tpu.matmul %8, %12, %cst_12 {dimension_numbers = #tpu.dot_dimension_numbers<[1], [0], [0], [1], [0, 0, 1, 1], [], []>} : vector<16x32xf32>, vector<32x96xf32>, vector<16x96xf32> -> vector<16x96xf32>
    %c0_13 = arith.constant 0 : index
    %c0_14 = arith.constant 0 : index
    %c0_15 = arith.constant 0 : index
    %14 = vector.load %arg5[%c0_13, %c0_14, %c0_15] : memref<2x1x96xf32, #tpu.memory_space<vmem>>, vector<1x1x96xf32>
    %15 = vector.shape_cast %14 : vector<1x1x96xf32> to vector<1x96xf32>
    %16 = vector.broadcast %15 : vector<1x96xf32> to vector<16x96xf32>
    %17 = arith.addf %13, %16 : vector<16x96xf32>
    %18 = vector.shape_cast %17 : vector<16x96xf32> to vector<2x8x96xf32>
    %c0_16 = arith.constant 0 : index
    %c0_17 = arith.constant 0 : index
    %c0_18 = arith.constant 0 : index
    %19 = vector.load %arg4[%c0_16, %c0_17, %c0_18] : memref<2x32x96xf32, #tpu.memory_space<vmem>>, vector<1x32x96xf32>
    %20 = vector.shape_cast %19 : vector<1x32x96xf32> to vector<32x96xf32>
    %c0_19 = arith.constant 0 : index
    %c0_20 = arith.constant 0 : index
    %c0_21 = arith.constant 0 : index
    %21 = vector.load %arg6[%c0_19, %c0_20, %c0_21] : memref<2x1x32xf32, #tpu.memory_space<vmem>>, vector<1x1x32xf32>
    %22 = vector.shape_cast %21 : vector<1x1x32xf32> to vector<1x32xf32>
    %cst_22 = arith.constant dense<0.000000e+00> : vector<2x96xf32>
    %23 = tpu.matmul %10, %20, %cst_22 {dimension_numbers = #tpu.dot_dimension_numbers<[1], [0], [0], [1], [0, 0, 1, 1], [], []>} : vector<2x32xf32>, vector<32x96xf32>, vector<2x96xf32> -> vector<2x96xf32>
    %24 = vector.extract_strided_slice %18 {offsets = [0, 0, 0], sizes = [2, 1, 96], strides = [1, 1, 1]} : vector<2x8x96xf32> to vector<2x1x96xf32>
    %25 = vector.shape_cast %24 : vector<2x1x96xf32> to vector<2x96xf32>
    %26 = vector.extract_strided_slice %25 {offsets = [0, 0], sizes = [2, 32], strides = [1, 1]} : vector<2x96xf32> to vector<2x32xf32>
    %27 = vector.extract_strided_slice %23 {offsets = [0, 0], sizes = [2, 32], strides = [1, 1]} : vector<2x96xf32> to vector<2x32xf32>
    %28 = arith.addf %26, %27 : vector<2x32xf32>
    %29 = arith.negf %28 : vector<2x32xf32>
    %30 = math.exp %29 : vector<2x32xf32>
    %cst_23 = arith.constant 1.000000e+00 : f32
    %31 = vector.broadcast %cst_23 : f32 to vector<2x32xf32>
    %32 = arith.addf %31, %30 : vector<2x32xf32>
    %33 = arith.divf %31, %32 : vector<2x32xf32>
    %34 = vector.extract_strided_slice %25 {offsets = [0, 32], sizes = [2, 32], strides = [1, 1]} : vector<2x96xf32> to vector<2x32xf32>
    %35 = vector.extract_strided_slice %23 {offsets = [0, 32], sizes = [2, 32], strides = [1, 1]} : vector<2x96xf32> to vector<2x32xf32>
    %36 = arith.addf %34, %35 : vector<2x32xf32>
    %37 = arith.negf %36 : vector<2x32xf32>
    %38 = math.exp %37 : vector<2x32xf32>
    %cst_24 = arith.constant 1.000000e+00 : f32
    %39 = vector.broadcast %cst_24 : f32 to vector<2x32xf32>
    %40 = arith.addf %39, %38 : vector<2x32xf32>
    %41 = arith.divf %39, %40 : vector<2x32xf32>
    %42 = vector.extract_strided_slice %25 {offsets = [0, 64], sizes = [2, 32], strides = [1, 1]} : vector<2x96xf32> to vector<2x32xf32>
    %43 = vector.extract_strided_slice %23 {offsets = [0, 64], sizes = [2, 32], strides = [1, 1]} : vector<2x96xf32> to vector<2x32xf32>
    %44 = vector.broadcast %22 : vector<1x32xf32> to vector<2x32xf32>
    %45 = arith.addf %43, %44 : vector<2x32xf32>
    %46 = arith.mulf %33, %45 : vector<2x32xf32>
    %47 = arith.addf %42, %46 : vector<2x32xf32>
    %48 = math.tanh %47 : vector<2x32xf32>
    %49 = arith.subf %10, %48 : vector<2x32xf32>
    %50 = arith.mulf %41, %49 : vector<2x32xf32>
    %51 = arith.addf %48, %50 : vector<2x32xf32>
    %cst_25 = arith.constant dense<0.000000e+00> : vector<2x96xf32>
    %52 = tpu.matmul %51, %20, %cst_25 {dimension_numbers = #tpu.dot_dimension_numbers<[1], [0], [0], [1], [0, 0, 1, 1], [], []>} : vector<2x32xf32>, vector<32x96xf32>, vector<2x96xf32> -> vector<2x96xf32>
    %53 = vector.extract_strided_slice %18 {offsets = [0, 1, 0], sizes = [2, 1, 96], strides = [1, 1, 1]} : vector<2x8x96xf32> to vector<2x1x96xf32>
    %54 = vector.shape_cast %53 : vector<2x1x96xf32> to vector<2x96xf32>
    %55 = vector.extract_strided_slice %54 {offsets = [0, 0], sizes = [2, 32], strides = [1, 1]} : vector<2x96xf32> to vector<2x32xf32>
    %56 = vector.extract_strided_slice %52 {offsets = [0, 0], sizes = [2, 32], strides = [1, 1]} : vector<2x96xf32> to vector<2x32xf32>
    %57 = arith.addf %55, %56 : vector<2x32xf32>
    %58 = arith.negf %57 : vector<2x32xf32>
    %59 = math.exp %58 : vector<2x32xf32>
    %cst_26 = arith.constant 1.000000e+00 : f32
    %60 = vector.broadcast %cst_26 : f32 to vector<2x32xf32>
    %61 = arith.addf %60, %59 : vector<2x32xf32>
    %62 = arith.divf %60, %61 : vector<2x32xf32>
    %63 = vector.extract_strided_slice %54 {offsets = [0, 32], sizes = [2, 32], strides = [1, 1]} : vector<2x96xf32> to vector<2x32xf32>
    %64 = vector.extract_strided_slice %52 {offsets = [0, 32], sizes = [2, 32], strides = [1, 1]} : vector<2x96xf32> to vector<2x32xf32>
    %65 = arith.addf %63, %64 : vector<2x32xf32>
    %66 = arith.negf %65 : vector<2x32xf32>
    %67 = math.exp %66 : vector<2x32xf32>
    %cst_27 = arith.constant 1.000000e+00 : f32
    %68 = vector.broadcast %cst_27 : f32 to vector<2x32xf32>
    %69 = arith.addf %68, %67 : vector<2x32xf32>
    %70 = arith.divf %68, %69 : vector<2x32xf32>
    %71 = vector.extract_strided_slice %54 {offsets = [0, 64], sizes = [2, 32], strides = [1, 1]} : vector<2x96xf32> to vector<2x32xf32>
    %72 = vector.extract_strided_slice %52 {offsets = [0, 64], sizes = [2, 32], strides = [1, 1]} : vector<2x96xf32> to vector<2x32xf32>
    %73 = vector.broadcast %22 : vector<1x32xf32> to vector<2x32xf32>
    %74 = arith.addf %72, %73 : vector<2x32xf32>
    %75 = arith.mulf %62, %74 : vector<2x32xf32>
    %76 = arith.addf %71, %75 : vector<2x32xf32>
    %77 = math.tanh %76 : vector<2x32xf32>
    %78 = arith.subf %51, %77 : vector<2x32xf32>
    %79 = arith.mulf %70, %78 : vector<2x32xf32>
    %80 = arith.addf %77, %79 : vector<2x32xf32>
    %cst_28 = arith.constant dense<0.000000e+00> : vector<2x96xf32>
    %81 = tpu.matmul %80, %20, %cst_28 {dimension_numbers = #tpu.dot_dimension_numbers<[1], [0], [0], [1], [0, 0, 1, 1], [], []>} : vector<2x32xf32>, vector<32x96xf32>, vector<2x96xf32> -> vector<2x96xf32>
    %82 = vector.extract_strided_slice %18 {offsets = [0, 2, 0], sizes = [2, 1, 96], strides = [1, 1, 1]} : vector<2x8x96xf32> to vector<2x1x96xf32>
    %83 = vector.shape_cast %82 : vector<2x1x96xf32> to vector<2x96xf32>
    %84 = vector.extract_strided_slice %83 {offsets = [0, 0], sizes = [2, 32], strides = [1, 1]} : vector<2x96xf32> to vector<2x32xf32>
    %85 = vector.extract_strided_slice %81 {offsets = [0, 0], sizes = [2, 32], strides = [1, 1]} : vector<2x96xf32> to vector<2x32xf32>
    %86 = arith.addf %84, %85 : vector<2x32xf32>
    %87 = arith.negf %86 : vector<2x32xf32>
    %88 = math.exp %87 : vector<2x32xf32>
    %cst_29 = arith.constant 1.000000e+00 : f32
    %89 = vector.broadcast %cst_29 : f32 to vector<2x32xf32>
    %90 = arith.addf %89, %88 : vector<2x32xf32>
    %91 = arith.divf %89, %90 : vector<2x32xf32>
    %92 = vector.extract_strided_slice %83 {offsets = [0, 32], sizes = [2, 32], strides = [1, 1]} : vector<2x96xf32> to vector<2x32xf32>
    %93 = vector.extract_strided_slice %81 {offsets = [0, 32], sizes = [2, 32], strides = [1, 1]} : vector<2x96xf32> to vector<2x32xf32>
    %94 = arith.addf %92, %93 : vector<2x32xf32>
    %95 = arith.negf %94 : vector<2x32xf32>
    %96 = math.exp %95 : vector<2x32xf32>
    %cst_30 = arith.constant 1.000000e+00 : f32
    %97 = vector.broadcast %cst_30 : f32 to vector<2x32xf32>
    %98 = arith.addf %97, %96 : vector<2x32xf32>
    %99 = arith.divf %97, %98 : vector<2x32xf32>
    %100 = vector.extract_strided_slice %83 {offsets = [0, 64], sizes = [2, 32], strides = [1, 1]} : vector<2x96xf32> to vector<2x32xf32>
    %101 = vector.extract_strided_slice %81 {offsets = [0, 64], sizes = [2, 32], strides = [1, 1]} : vector<2x96xf32> to vector<2x32xf32>
    %102 = vector.broadcast %22 : vector<1x32xf32> to vector<2x32xf32>
    %103 = arith.addf %101, %102 : vector<2x32xf32>
    %104 = arith.mulf %91, %103 : vector<2x32xf32>
    %105 = arith.addf %100, %104 : vector<2x32xf32>
    %106 = math.tanh %105 : vector<2x32xf32>
    %107 = arith.subf %80, %106 : vector<2x32xf32>
    %108 = arith.mulf %99, %107 : vector<2x32xf32>
    %109 = arith.addf %106, %108 : vector<2x32xf32>
    %cst_31 = arith.constant dense<0.000000e+00> : vector<2x96xf32>
    %110 = tpu.matmul %109, %20, %cst_31 {dimension_numbers = #tpu.dot_dimension_numbers<[1], [0], [0], [1], [0, 0, 1, 1], [], []>} : vector<2x32xf32>, vector<32x96xf32>, vector<2x96xf32> -> vector<2x96xf32>
    %111 = vector.extract_strided_slice %18 {offsets = [0, 3, 0], sizes = [2, 1, 96], strides = [1, 1, 1]} : vector<2x8x96xf32> to vector<2x1x96xf32>
    %112 = vector.shape_cast %111 : vector<2x1x96xf32> to vector<2x96xf32>
    %113 = vector.extract_strided_slice %112 {offsets = [0, 0], sizes = [2, 32], strides = [1, 1]} : vector<2x96xf32> to vector<2x32xf32>
    %114 = vector.extract_strided_slice %110 {offsets = [0, 0], sizes = [2, 32], strides = [1, 1]} : vector<2x96xf32> to vector<2x32xf32>
    %115 = arith.addf %113, %114 : vector<2x32xf32>
    %116 = arith.negf %115 : vector<2x32xf32>
    %117 = math.exp %116 : vector<2x32xf32>
    %cst_32 = arith.constant 1.000000e+00 : f32
    %118 = vector.broadcast %cst_32 : f32 to vector<2x32xf32>
    %119 = arith.addf %118, %117 : vector<2x32xf32>
    %120 = arith.divf %118, %119 : vector<2x32xf32>
    %121 = vector.extract_strided_slice %112 {offsets = [0, 32], sizes = [2, 32], strides = [1, 1]} : vector<2x96xf32> to vector<2x32xf32>
    %122 = vector.extract_strided_slice %110 {offsets = [0, 32], sizes = [2, 32], strides = [1, 1]} : vector<2x96xf32> to vector<2x32xf32>
    %123 = arith.addf %121, %122 : vector<2x32xf32>
    %124 = arith.negf %123 : vector<2x32xf32>
    %125 = math.exp %124 : vector<2x32xf32>
    %cst_33 = arith.constant 1.000000e+00 : f32
    %126 = vector.broadcast %cst_33 : f32 to vector<2x32xf32>
    %127 = arith.addf %126, %125 : vector<2x32xf32>
    %128 = arith.divf %126, %127 : vector<2x32xf32>
    %129 = vector.extract_strided_slice %112 {offsets = [0, 64], sizes = [2, 32], strides = [1, 1]} : vector<2x96xf32> to vector<2x32xf32>
    %130 = vector.extract_strided_slice %110 {offsets = [0, 64], sizes = [2, 32], strides = [1, 1]} : vector<2x96xf32> to vector<2x32xf32>
    %131 = vector.broadcast %22 : vector<1x32xf32> to vector<2x32xf32>
    %132 = arith.addf %130, %131 : vector<2x32xf32>
    %133 = arith.mulf %120, %132 : vector<2x32xf32>
    %134 = arith.addf %129, %133 : vector<2x32xf32>
    %135 = math.tanh %134 : vector<2x32xf32>
    %136 = arith.subf %109, %135 : vector<2x32xf32>
    %137 = arith.mulf %128, %136 : vector<2x32xf32>
    %138 = arith.addf %135, %137 : vector<2x32xf32>
    %cst_34 = arith.constant dense<0.000000e+00> : vector<2x96xf32>
    %139 = tpu.matmul %138, %20, %cst_34 {dimension_numbers = #tpu.dot_dimension_numbers<[1], [0], [0], [1], [0, 0, 1, 1], [], []>} : vector<2x32xf32>, vector<32x96xf32>, vector<2x96xf32> -> vector<2x96xf32>
    %140 = vector.extract_strided_slice %18 {offsets = [0, 4, 0], sizes = [2, 1, 96], strides = [1, 1, 1]} : vector<2x8x96xf32> to vector<2x1x96xf32>
    %141 = vector.shape_cast %140 : vector<2x1x96xf32> to vector<2x96xf32>
    %142 = vector.extract_strided_slice %141 {offsets = [0, 0], sizes = [2, 32], strides = [1, 1]} : vector<2x96xf32> to vector<2x32xf32>
    %143 = vector.extract_strided_slice %139 {offsets = [0, 0], sizes = [2, 32], strides = [1, 1]} : vector<2x96xf32> to vector<2x32xf32>
    %144 = arith.addf %142, %143 : vector<2x32xf32>
    %145 = arith.negf %144 : vector<2x32xf32>
    %146 = math.exp %145 : vector<2x32xf32>
    %cst_35 = arith.constant 1.000000e+00 : f32
    %147 = vector.broadcast %cst_35 : f32 to vector<2x32xf32>
    %148 = arith.addf %147, %146 : vector<2x32xf32>
    %149 = arith.divf %147, %148 : vector<2x32xf32>
    %150 = vector.extract_strided_slice %141 {offsets = [0, 32], sizes = [2, 32], strides = [1, 1]} : vector<2x96xf32> to vector<2x32xf32>
    %151 = vector.extract_strided_slice %139 {offsets = [0, 32], sizes = [2, 32], strides = [1, 1]} : vector<2x96xf32> to vector<2x32xf32>
    %152 = arith.addf %150, %151 : vector<2x32xf32>
    %153 = arith.negf %152 : vector<2x32xf32>
    %154 = math.exp %153 : vector<2x32xf32>
    %cst_36 = arith.constant 1.000000e+00 : f32
    %155 = vector.broadcast %cst_36 : f32 to vector<2x32xf32>
    %156 = arith.addf %155, %154 : vector<2x32xf32>
    %157 = arith.divf %155, %156 : vector<2x32xf32>
    %158 = vector.extract_strided_slice %141 {offsets = [0, 64], sizes = [2, 32], strides = [1, 1]} : vector<2x96xf32> to vector<2x32xf32>
    %159 = vector.extract_strided_slice %139 {offsets = [0, 64], sizes = [2, 32], strides = [1, 1]} : vector<2x96xf32> to vector<2x32xf32>
    %160 = vector.broadcast %22 : vector<1x32xf32> to vector<2x32xf32>
    %161 = arith.addf %159, %160 : vector<2x32xf32>
    %162 = arith.mulf %149, %161 : vector<2x32xf32>
    %163 = arith.addf %158, %162 : vector<2x32xf32>
    %164 = math.tanh %163 : vector<2x32xf32>
    %165 = arith.subf %138, %164 : vector<2x32xf32>
    %166 = arith.mulf %157, %165 : vector<2x32xf32>
    %167 = arith.addf %164, %166 : vector<2x32xf32>
    %cst_37 = arith.constant dense<0.000000e+00> : vector<2x96xf32>
    %168 = tpu.matmul %167, %20, %cst_37 {dimension_numbers = #tpu.dot_dimension_numbers<[1], [0], [0], [1], [0, 0, 1, 1], [], []>} : vector<2x32xf32>, vector<32x96xf32>, vector<2x96xf32> -> vector<2x96xf32>
    %169 = vector.extract_strided_slice %18 {offsets = [0, 5, 0], sizes = [2, 1, 96], strides = [1, 1, 1]} : vector<2x8x96xf32> to vector<2x1x96xf32>
    %170 = vector.shape_cast %169 : vector<2x1x96xf32> to vector<2x96xf32>
    %171 = vector.extract_strided_slice %170 {offsets = [0, 0], sizes = [2, 32], strides = [1, 1]} : vector<2x96xf32> to vector<2x32xf32>
    %172 = vector.extract_strided_slice %168 {offsets = [0, 0], sizes = [2, 32], strides = [1, 1]} : vector<2x96xf32> to vector<2x32xf32>
    %173 = arith.addf %171, %172 : vector<2x32xf32>
    %174 = arith.negf %173 : vector<2x32xf32>
    %175 = math.exp %174 : vector<2x32xf32>
    %cst_38 = arith.constant 1.000000e+00 : f32
    %176 = vector.broadcast %cst_38 : f32 to vector<2x32xf32>
    %177 = arith.addf %176, %175 : vector<2x32xf32>
    %178 = arith.divf %176, %177 : vector<2x32xf32>
    %179 = vector.extract_strided_slice %170 {offsets = [0, 32], sizes = [2, 32], strides = [1, 1]} : vector<2x96xf32> to vector<2x32xf32>
    %180 = vector.extract_strided_slice %168 {offsets = [0, 32], sizes = [2, 32], strides = [1, 1]} : vector<2x96xf32> to vector<2x32xf32>
    %181 = arith.addf %179, %180 : vector<2x32xf32>
    %182 = arith.negf %181 : vector<2x32xf32>
    %183 = math.exp %182 : vector<2x32xf32>
    %cst_39 = arith.constant 1.000000e+00 : f32
    %184 = vector.broadcast %cst_39 : f32 to vector<2x32xf32>
    %185 = arith.addf %184, %183 : vector<2x32xf32>
    %186 = arith.divf %184, %185 : vector<2x32xf32>
    %187 = vector.extract_strided_slice %170 {offsets = [0, 64], sizes = [2, 32], strides = [1, 1]} : vector<2x96xf32> to vector<2x32xf32>
    %188 = vector.extract_strided_slice %168 {offsets = [0, 64], sizes = [2, 32], strides = [1, 1]} : vector<2x96xf32> to vector<2x32xf32>
    %189 = vector.broadcast %22 : vector<1x32xf32> to vector<2x32xf32>
    %190 = arith.addf %188, %189 : vector<2x32xf32>
    %191 = arith.mulf %178, %190 : vector<2x32xf32>
    %192 = arith.addf %187, %191 : vector<2x32xf32>
    %193 = math.tanh %192 : vector<2x32xf32>
    %194 = arith.subf %167, %193 : vector<2x32xf32>
    %195 = arith.mulf %186, %194 : vector<2x32xf32>
    %196 = arith.addf %193, %195 : vector<2x32xf32>
    %cst_40 = arith.constant dense<0.000000e+00> : vector<2x96xf32>
    %197 = tpu.matmul %196, %20, %cst_40 {dimension_numbers = #tpu.dot_dimension_numbers<[1], [0], [0], [1], [0, 0, 1, 1], [], []>} : vector<2x32xf32>, vector<32x96xf32>, vector<2x96xf32> -> vector<2x96xf32>
    %198 = vector.extract_strided_slice %18 {offsets = [0, 6, 0], sizes = [2, 1, 96], strides = [1, 1, 1]} : vector<2x8x96xf32> to vector<2x1x96xf32>
    %199 = vector.shape_cast %198 : vector<2x1x96xf32> to vector<2x96xf32>
    %200 = vector.extract_strided_slice %199 {offsets = [0, 0], sizes = [2, 32], strides = [1, 1]} : vector<2x96xf32> to vector<2x32xf32>
    %201 = vector.extract_strided_slice %197 {offsets = [0, 0], sizes = [2, 32], strides = [1, 1]} : vector<2x96xf32> to vector<2x32xf32>
    %202 = arith.addf %200, %201 : vector<2x32xf32>
    %203 = arith.negf %202 : vector<2x32xf32>
    %204 = math.exp %203 : vector<2x32xf32>
    %cst_41 = arith.constant 1.000000e+00 : f32
    %205 = vector.broadcast %cst_41 : f32 to vector<2x32xf32>
    %206 = arith.addf %205, %204 : vector<2x32xf32>
    %207 = arith.divf %205, %206 : vector<2x32xf32>
    %208 = vector.extract_strided_slice %199 {offsets = [0, 32], sizes = [2, 32], strides = [1, 1]} : vector<2x96xf32> to vector<2x32xf32>
    %209 = vector.extract_strided_slice %197 {offsets = [0, 32], sizes = [2, 32], strides = [1, 1]} : vector<2x96xf32> to vector<2x32xf32>
    %210 = arith.addf %208, %209 : vector<2x32xf32>
    %211 = arith.negf %210 : vector<2x32xf32>
    %212 = math.exp %211 : vector<2x32xf32>
    %cst_42 = arith.constant 1.000000e+00 : f32
    %213 = vector.broadcast %cst_42 : f32 to vector<2x32xf32>
    %214 = arith.addf %213, %212 : vector<2x32xf32>
    %215 = arith.divf %213, %214 : vector<2x32xf32>
    %216 = vector.extract_strided_slice %199 {offsets = [0, 64], sizes = [2, 32], strides = [1, 1]} : vector<2x96xf32> to vector<2x32xf32>
    %217 = vector.extract_strided_slice %197 {offsets = [0, 64], sizes = [2, 32], strides = [1, 1]} : vector<2x96xf32> to vector<2x32xf32>
    %218 = vector.broadcast %22 : vector<1x32xf32> to vector<2x32xf32>
    %219 = arith.addf %217, %218 : vector<2x32xf32>
    %220 = arith.mulf %207, %219 : vector<2x32xf32>
    %221 = arith.addf %216, %220 : vector<2x32xf32>
    %222 = math.tanh %221 : vector<2x32xf32>
    %223 = arith.subf %196, %222 : vector<2x32xf32>
    %224 = arith.mulf %215, %223 : vector<2x32xf32>
    %225 = arith.addf %222, %224 : vector<2x32xf32>
    %cst_43 = arith.constant dense<0.000000e+00> : vector<2x96xf32>
    %226 = tpu.matmul %225, %20, %cst_43 {dimension_numbers = #tpu.dot_dimension_numbers<[1], [0], [0], [1], [0, 0, 1, 1], [], []>} : vector<2x32xf32>, vector<32x96xf32>, vector<2x96xf32> -> vector<2x96xf32>
    %227 = vector.extract_strided_slice %18 {offsets = [0, 7, 0], sizes = [2, 1, 96], strides = [1, 1, 1]} : vector<2x8x96xf32> to vector<2x1x96xf32>
    %228 = vector.shape_cast %227 : vector<2x1x96xf32> to vector<2x96xf32>
    %229 = vector.extract_strided_slice %228 {offsets = [0, 0], sizes = [2, 32], strides = [1, 1]} : vector<2x96xf32> to vector<2x32xf32>
    %230 = vector.extract_strided_slice %226 {offsets = [0, 0], sizes = [2, 32], strides = [1, 1]} : vector<2x96xf32> to vector<2x32xf32>
    %231 = arith.addf %229, %230 : vector<2x32xf32>
    %232 = arith.negf %231 : vector<2x32xf32>
    %233 = math.exp %232 : vector<2x32xf32>
    %cst_44 = arith.constant 1.000000e+00 : f32
    %234 = vector.broadcast %cst_44 : f32 to vector<2x32xf32>
    %235 = arith.addf %234, %233 : vector<2x32xf32>
    %236 = arith.divf %234, %235 : vector<2x32xf32>
    %237 = vector.extract_strided_slice %228 {offsets = [0, 32], sizes = [2, 32], strides = [1, 1]} : vector<2x96xf32> to vector<2x32xf32>
    %238 = vector.extract_strided_slice %226 {offsets = [0, 32], sizes = [2, 32], strides = [1, 1]} : vector<2x96xf32> to vector<2x32xf32>
    %239 = arith.addf %237, %238 : vector<2x32xf32>
    %240 = arith.negf %239 : vector<2x32xf32>
    %241 = math.exp %240 : vector<2x32xf32>
    %cst_45 = arith.constant 1.000000e+00 : f32
    %242 = vector.broadcast %cst_45 : f32 to vector<2x32xf32>
    %243 = arith.addf %242, %241 : vector<2x32xf32>
    %244 = arith.divf %242, %243 : vector<2x32xf32>
    %245 = vector.extract_strided_slice %228 {offsets = [0, 64], sizes = [2, 32], strides = [1, 1]} : vector<2x96xf32> to vector<2x32xf32>
    %246 = vector.extract_strided_slice %226 {offsets = [0, 64], sizes = [2, 32], strides = [1, 1]} : vector<2x96xf32> to vector<2x32xf32>
    %247 = vector.broadcast %22 : vector<1x32xf32> to vector<2x32xf32>
    %248 = arith.addf %246, %247 : vector<2x32xf32>
    %249 = arith.mulf %236, %248 : vector<2x32xf32>
    %250 = arith.addf %245, %249 : vector<2x32xf32>
    %251 = math.tanh %250 : vector<2x32xf32>
    %252 = arith.subf %225, %251 : vector<2x32xf32>
    %253 = arith.mulf %244, %252 : vector<2x32xf32>
    %254 = arith.addf %251, %253 : vector<2x32xf32>
    %255 = vector.shape_cast %51 : vector<2x32xf32> to vector<2x1x32xf32>
    %256 = vector.shape_cast %80 : vector<2x32xf32> to vector<2x1x32xf32>
    %257 = vector.shape_cast %109 : vector<2x32xf32> to vector<2x1x32xf32>
    %258 = vector.shape_cast %138 : vector<2x32xf32> to vector<2x1x32xf32>
    %259 = vector.shape_cast %167 : vector<2x32xf32> to vector<2x1x32xf32>
    %260 = vector.shape_cast %196 : vector<2x32xf32> to vector<2x1x32xf32>
    %261 = vector.shape_cast %225 : vector<2x32xf32> to vector<2x1x32xf32>
    %262 = vector.shape_cast %254 : vector<2x32xf32> to vector<2x1x32xf32>
    %263 = tpu.concatenate %255, %256, %257, %258, %259, %260, %261, %262 in 1 : vector<2x1x32xf32>, vector<2x1x32xf32>, vector<2x1x32xf32>, vector<2x1x32xf32>, vector<2x1x32xf32>, vector<2x1x32xf32>, vector<2x1x32xf32>, vector<2x1x32xf32> -> vector<2x8x32xf32>
    %264 = vector.shape_cast %263 : vector<2x8x32xf32> to vector<16x32xf32>
    %c1 = arith.constant 1 : index
    %c0_46 = arith.constant 0 : index
    %c0_47 = arith.constant 0 : index
    %265 = vector.load %arg3[%c1, %c0_46, %c0_47] : memref<2x32x96xf32, #tpu.memory_space<vmem>>, vector<1x32x96xf32>
    %266 = vector.shape_cast %265 : vector<1x32x96xf32> to vector<32x96xf32>
    %cst_48 = arith.constant dense<0.000000e+00> : vector<16x96xf32>
    %267 = tpu.matmul %264, %266, %cst_48 {dimension_numbers = #tpu.dot_dimension_numbers<[1], [0], [0], [1], [0, 0, 1, 1], [], []>} : vector<16x32xf32>, vector<32x96xf32>, vector<16x96xf32> -> vector<16x96xf32>
    %c1_49 = arith.constant 1 : index
    %c0_50 = arith.constant 0 : index
    %c0_51 = arith.constant 0 : index
    %268 = vector.load %arg5[%c1_49, %c0_50, %c0_51] : memref<2x1x96xf32, #tpu.memory_space<vmem>>, vector<1x1x96xf32>
    %269 = vector.shape_cast %268 : vector<1x1x96xf32> to vector<1x96xf32>
    %270 = vector.broadcast %269 : vector<1x96xf32> to vector<16x96xf32>
    %271 = arith.addf %267, %270 : vector<16x96xf32>
    %272 = vector.shape_cast %271 : vector<16x96xf32> to vector<2x8x96xf32>
    %c1_52 = arith.constant 1 : index
    %c0_53 = arith.constant 0 : index
    %c0_54 = arith.constant 0 : index
    %273 = vector.load %arg4[%c1_52, %c0_53, %c0_54] : memref<2x32x96xf32, #tpu.memory_space<vmem>>, vector<1x32x96xf32>
    %274 = vector.shape_cast %273 : vector<1x32x96xf32> to vector<32x96xf32>
    %c1_55 = arith.constant 1 : index
    %c0_56 = arith.constant 0 : index
    %c0_57 = arith.constant 0 : index
    %275 = vector.load %arg6[%c1_55, %c0_56, %c0_57] : memref<2x1x32xf32, #tpu.memory_space<vmem>>, vector<1x1x32xf32>
    %276 = vector.shape_cast %275 : vector<1x1x32xf32> to vector<1x32xf32>
    %cst_58 = arith.constant dense<0.000000e+00> : vector<2x96xf32>
    %277 = tpu.matmul %10, %274, %cst_58 {dimension_numbers = #tpu.dot_dimension_numbers<[1], [0], [0], [1], [0, 0, 1, 1], [], []>} : vector<2x32xf32>, vector<32x96xf32>, vector<2x96xf32> -> vector<2x96xf32>
    %278 = vector.extract_strided_slice %272 {offsets = [0, 0, 0], sizes = [2, 1, 96], strides = [1, 1, 1]} : vector<2x8x96xf32> to vector<2x1x96xf32>
    %279 = vector.shape_cast %278 : vector<2x1x96xf32> to vector<2x96xf32>
    %280 = vector.extract_strided_slice %279 {offsets = [0, 0], sizes = [2, 32], strides = [1, 1]} : vector<2x96xf32> to vector<2x32xf32>
    %281 = vector.extract_strided_slice %277 {offsets = [0, 0], sizes = [2, 32], strides = [1, 1]} : vector<2x96xf32> to vector<2x32xf32>
    %282 = arith.addf %280, %281 : vector<2x32xf32>
    %283 = arith.negf %282 : vector<2x32xf32>
    %284 = math.exp %283 : vector<2x32xf32>
    %cst_59 = arith.constant 1.000000e+00 : f32
    %285 = vector.broadcast %cst_59 : f32 to vector<2x32xf32>
    %286 = arith.addf %285, %284 : vector<2x32xf32>
    %287 = arith.divf %285, %286 : vector<2x32xf32>
    %288 = vector.extract_strided_slice %279 {offsets = [0, 32], sizes = [2, 32], strides = [1, 1]} : vector<2x96xf32> to vector<2x32xf32>
    %289 = vector.extract_strided_slice %277 {offsets = [0, 32], sizes = [2, 32], strides = [1, 1]} : vector<2x96xf32> to vector<2x32xf32>
    %290 = arith.addf %288, %289 : vector<2x32xf32>
    %291 = arith.negf %290 : vector<2x32xf32>
    %292 = math.exp %291 : vector<2x32xf32>
    %cst_60 = arith.constant 1.000000e+00 : f32
    %293 = vector.broadcast %cst_60 : f32 to vector<2x32xf32>
    %294 = arith.addf %293, %292 : vector<2x32xf32>
    %295 = arith.divf %293, %294 : vector<2x32xf32>
    %296 = vector.extract_strided_slice %279 {offsets = [0, 64], sizes = [2, 32], strides = [1, 1]} : vector<2x96xf32> to vector<2x32xf32>
    %297 = vector.extract_strided_slice %277 {offsets = [0, 64], sizes = [2, 32], strides = [1, 1]} : vector<2x96xf32> to vector<2x32xf32>
    %298 = vector.broadcast %276 : vector<1x32xf32> to vector<2x32xf32>
    %299 = arith.addf %297, %298 : vector<2x32xf32>
    %300 = arith.mulf %287, %299 : vector<2x32xf32>
    %301 = arith.addf %296, %300 : vector<2x32xf32>
    %302 = math.tanh %301 : vector<2x32xf32>
    %303 = arith.subf %10, %302 : vector<2x32xf32>
    %304 = arith.mulf %295, %303 : vector<2x32xf32>
    %305 = arith.addf %302, %304 : vector<2x32xf32>
    %cst_61 = arith.constant dense<0.000000e+00> : vector<2x96xf32>
    %306 = tpu.matmul %305, %274, %cst_61 {dimension_numbers = #tpu.dot_dimension_numbers<[1], [0], [0], [1], [0, 0, 1, 1], [], []>} : vector<2x32xf32>, vector<32x96xf32>, vector<2x96xf32> -> vector<2x96xf32>
    %307 = vector.extract_strided_slice %272 {offsets = [0, 1, 0], sizes = [2, 1, 96], strides = [1, 1, 1]} : vector<2x8x96xf32> to vector<2x1x96xf32>
    %308 = vector.shape_cast %307 : vector<2x1x96xf32> to vector<2x96xf32>
    %309 = vector.extract_strided_slice %308 {offsets = [0, 0], sizes = [2, 32], strides = [1, 1]} : vector<2x96xf32> to vector<2x32xf32>
    %310 = vector.extract_strided_slice %306 {offsets = [0, 0], sizes = [2, 32], strides = [1, 1]} : vector<2x96xf32> to vector<2x32xf32>
    %311 = arith.addf %309, %310 : vector<2x32xf32>
    %312 = arith.negf %311 : vector<2x32xf32>
    %313 = math.exp %312 : vector<2x32xf32>
    %cst_62 = arith.constant 1.000000e+00 : f32
    %314 = vector.broadcast %cst_62 : f32 to vector<2x32xf32>
    %315 = arith.addf %314, %313 : vector<2x32xf32>
    %316 = arith.divf %314, %315 : vector<2x32xf32>
    %317 = vector.extract_strided_slice %308 {offsets = [0, 32], sizes = [2, 32], strides = [1, 1]} : vector<2x96xf32> to vector<2x32xf32>
    %318 = vector.extract_strided_slice %306 {offsets = [0, 32], sizes = [2, 32], strides = [1, 1]} : vector<2x96xf32> to vector<2x32xf32>
    %319 = arith.addf %317, %318 : vector<2x32xf32>
    %320 = arith.negf %319 : vector<2x32xf32>
    %321 = math.exp %320 : vector<2x32xf32>
    %cst_63 = arith.constant 1.000000e+00 : f32
    %322 = vector.broadcast %cst_63 : f32 to vector<2x32xf32>
    %323 = arith.addf %322, %321 : vector<2x32xf32>
    %324 = arith.divf %322, %323 : vector<2x32xf32>
    %325 = vector.extract_strided_slice %308 {offsets = [0, 64], sizes = [2, 32], strides = [1, 1]} : vector<2x96xf32> to vector<2x32xf32>
    %326 = vector.extract_strided_slice %306 {offsets = [0, 64], sizes = [2, 32], strides = [1, 1]} : vector<2x96xf32> to vector<2x32xf32>
    %327 = vector.broadcast %276 : vector<1x32xf32> to vector<2x32xf32>
    %328 = arith.addf %326, %327 : vector<2x32xf32>
    %329 = arith.mulf %316, %328 : vector<2x32xf32>
    %330 = arith.addf %325, %329 : vector<2x32xf32>
    %331 = math.tanh %330 : vector<2x32xf32>
    %332 = arith.subf %305, %331 : vector<2x32xf32>
    %333 = arith.mulf %324, %332 : vector<2x32xf32>
    %334 = arith.addf %331, %333 : vector<2x32xf32>
    %cst_64 = arith.constant dense<0.000000e+00> : vector<2x96xf32>
    %335 = tpu.matmul %334, %274, %cst_64 {dimension_numbers = #tpu.dot_dimension_numbers<[1], [0], [0], [1], [0, 0, 1, 1], [], []>} : vector<2x32xf32>, vector<32x96xf32>, vector<2x96xf32> -> vector<2x96xf32>
    %336 = vector.extract_strided_slice %272 {offsets = [0, 2, 0], sizes = [2, 1, 96], strides = [1, 1, 1]} : vector<2x8x96xf32> to vector<2x1x96xf32>
    %337 = vector.shape_cast %336 : vector<2x1x96xf32> to vector<2x96xf32>
    %338 = vector.extract_strided_slice %337 {offsets = [0, 0], sizes = [2, 32], strides = [1, 1]} : vector<2x96xf32> to vector<2x32xf32>
    %339 = vector.extract_strided_slice %335 {offsets = [0, 0], sizes = [2, 32], strides = [1, 1]} : vector<2x96xf32> to vector<2x32xf32>
    %340 = arith.addf %338, %339 : vector<2x32xf32>
    %341 = arith.negf %340 : vector<2x32xf32>
    %342 = math.exp %341 : vector<2x32xf32>
    %cst_65 = arith.constant 1.000000e+00 : f32
    %343 = vector.broadcast %cst_65 : f32 to vector<2x32xf32>
    %344 = arith.addf %343, %342 : vector<2x32xf32>
    %345 = arith.divf %343, %344 : vector<2x32xf32>
    %346 = vector.extract_strided_slice %337 {offsets = [0, 32], sizes = [2, 32], strides = [1, 1]} : vector<2x96xf32> to vector<2x32xf32>
    %347 = vector.extract_strided_slice %335 {offsets = [0, 32], sizes = [2, 32], strides = [1, 1]} : vector<2x96xf32> to vector<2x32xf32>
    %348 = arith.addf %346, %347 : vector<2x32xf32>
    %349 = arith.negf %348 : vector<2x32xf32>
    %350 = math.exp %349 : vector<2x32xf32>
    %cst_66 = arith.constant 1.000000e+00 : f32
    %351 = vector.broadcast %cst_66 : f32 to vector<2x32xf32>
    %352 = arith.addf %351, %350 : vector<2x32xf32>
    %353 = arith.divf %351, %352 : vector<2x32xf32>
    %354 = vector.extract_strided_slice %337 {offsets = [0, 64], sizes = [2, 32], strides = [1, 1]} : vector<2x96xf32> to vector<2x32xf32>
    %355 = vector.extract_strided_slice %335 {offsets = [0, 64], sizes = [2, 32], strides = [1, 1]} : vector<2x96xf32> to vector<2x32xf32>
    %356 = vector.broadcast %276 : vector<1x32xf32> to vector<2x32xf32>
    %357 = arith.addf %355, %356 : vector<2x32xf32>
    %358 = arith.mulf %345, %357 : vector<2x32xf32>
    %359 = arith.addf %354, %358 : vector<2x32xf32>
    %360 = math.tanh %359 : vector<2x32xf32>
    %361 = arith.subf %334, %360 : vector<2x32xf32>
    %362 = arith.mulf %353, %361 : vector<2x32xf32>
    %363 = arith.addf %360, %362 : vector<2x32xf32>
    %cst_67 = arith.constant dense<0.000000e+00> : vector<2x96xf32>
    %364 = tpu.matmul %363, %274, %cst_67 {dimension_numbers = #tpu.dot_dimension_numbers<[1], [0], [0], [1], [0, 0, 1, 1], [], []>} : vector<2x32xf32>, vector<32x96xf32>, vector<2x96xf32> -> vector<2x96xf32>
    %365 = vector.extract_strided_slice %272 {offsets = [0, 3, 0], sizes = [2, 1, 96], strides = [1, 1, 1]} : vector<2x8x96xf32> to vector<2x1x96xf32>
    %366 = vector.shape_cast %365 : vector<2x1x96xf32> to vector<2x96xf32>
    %367 = vector.extract_strided_slice %366 {offsets = [0, 0], sizes = [2, 32], strides = [1, 1]} : vector<2x96xf32> to vector<2x32xf32>
    %368 = vector.extract_strided_slice %364 {offsets = [0, 0], sizes = [2, 32], strides = [1, 1]} : vector<2x96xf32> to vector<2x32xf32>
    %369 = arith.addf %367, %368 : vector<2x32xf32>
    %370 = arith.negf %369 : vector<2x32xf32>
    %371 = math.exp %370 : vector<2x32xf32>
    %cst_68 = arith.constant 1.000000e+00 : f32
    %372 = vector.broadcast %cst_68 : f32 to vector<2x32xf32>
    %373 = arith.addf %372, %371 : vector<2x32xf32>
    %374 = arith.divf %372, %373 : vector<2x32xf32>
    %375 = vector.extract_strided_slice %366 {offsets = [0, 32], sizes = [2, 32], strides = [1, 1]} : vector<2x96xf32> to vector<2x32xf32>
    %376 = vector.extract_strided_slice %364 {offsets = [0, 32], sizes = [2, 32], strides = [1, 1]} : vector<2x96xf32> to vector<2x32xf32>
    %377 = arith.addf %375, %376 : vector<2x32xf32>
    %378 = arith.negf %377 : vector<2x32xf32>
    %379 = math.exp %378 : vector<2x32xf32>
    %cst_69 = arith.constant 1.000000e+00 : f32
    %380 = vector.broadcast %cst_69 : f32 to vector<2x32xf32>
    %381 = arith.addf %380, %379 : vector<2x32xf32>
    %382 = arith.divf %380, %381 : vector<2x32xf32>
    %383 = vector.extract_strided_slice %366 {offsets = [0, 64], sizes = [2, 32], strides = [1, 1]} : vector<2x96xf32> to vector<2x32xf32>
    %384 = vector.extract_strided_slice %364 {offsets = [0, 64], sizes = [2, 32], strides = [1, 1]} : vector<2x96xf32> to vector<2x32xf32>
    %385 = vector.broadcast %276 : vector<1x32xf32> to vector<2x32xf32>
    %386 = arith.addf %384, %385 : vector<2x32xf32>
    %387 = arith.mulf %374, %386 : vector<2x32xf32>
    %388 = arith.addf %383, %387 : vector<2x32xf32>
    %389 = math.tanh %388 : vector<2x32xf32>
    %390 = arith.subf %363, %389 : vector<2x32xf32>
    %391 = arith.mulf %382, %390 : vector<2x32xf32>
    %392 = arith.addf %389, %391 : vector<2x32xf32>
    %cst_70 = arith.constant dense<0.000000e+00> : vector<2x96xf32>
    %393 = tpu.matmul %392, %274, %cst_70 {dimension_numbers = #tpu.dot_dimension_numbers<[1], [0], [0], [1], [0, 0, 1, 1], [], []>} : vector<2x32xf32>, vector<32x96xf32>, vector<2x96xf32> -> vector<2x96xf32>
    %394 = vector.extract_strided_slice %272 {offsets = [0, 4, 0], sizes = [2, 1, 96], strides = [1, 1, 1]} : vector<2x8x96xf32> to vector<2x1x96xf32>
    %395 = vector.shape_cast %394 : vector<2x1x96xf32> to vector<2x96xf32>
    %396 = vector.extract_strided_slice %395 {offsets = [0, 0], sizes = [2, 32], strides = [1, 1]} : vector<2x96xf32> to vector<2x32xf32>
    %397 = vector.extract_strided_slice %393 {offsets = [0, 0], sizes = [2, 32], strides = [1, 1]} : vector<2x96xf32> to vector<2x32xf32>
    %398 = arith.addf %396, %397 : vector<2x32xf32>
    %399 = arith.negf %398 : vector<2x32xf32>
    %400 = math.exp %399 : vector<2x32xf32>
    %cst_71 = arith.constant 1.000000e+00 : f32
    %401 = vector.broadcast %cst_71 : f32 to vector<2x32xf32>
    %402 = arith.addf %401, %400 : vector<2x32xf32>
    %403 = arith.divf %401, %402 : vector<2x32xf32>
    %404 = vector.extract_strided_slice %395 {offsets = [0, 32], sizes = [2, 32], strides = [1, 1]} : vector<2x96xf32> to vector<2x32xf32>
    %405 = vector.extract_strided_slice %393 {offsets = [0, 32], sizes = [2, 32], strides = [1, 1]} : vector<2x96xf32> to vector<2x32xf32>
    %406 = arith.addf %404, %405 : vector<2x32xf32>
    %407 = arith.negf %406 : vector<2x32xf32>
    %408 = math.exp %407 : vector<2x32xf32>
    %cst_72 = arith.constant 1.000000e+00 : f32
    %409 = vector.broadcast %cst_72 : f32 to vector<2x32xf32>
    %410 = arith.addf %409, %408 : vector<2x32xf32>
    %411 = arith.divf %409, %410 : vector<2x32xf32>
    %412 = vector.extract_strided_slice %395 {offsets = [0, 64], sizes = [2, 32], strides = [1, 1]} : vector<2x96xf32> to vector<2x32xf32>
    %413 = vector.extract_strided_slice %393 {offsets = [0, 64], sizes = [2, 32], strides = [1, 1]} : vector<2x96xf32> to vector<2x32xf32>
    %414 = vector.broadcast %276 : vector<1x32xf32> to vector<2x32xf32>
    %415 = arith.addf %413, %414 : vector<2x32xf32>
    %416 = arith.mulf %403, %415 : vector<2x32xf32>
    %417 = arith.addf %412, %416 : vector<2x32xf32>
    %418 = math.tanh %417 : vector<2x32xf32>
    %419 = arith.subf %392, %418 : vector<2x32xf32>
    %420 = arith.mulf %411, %419 : vector<2x32xf32>
    %421 = arith.addf %418, %420 : vector<2x32xf32>
    %cst_73 = arith.constant dense<0.000000e+00> : vector<2x96xf32>
    %422 = tpu.matmul %421, %274, %cst_73 {dimension_numbers = #tpu.dot_dimension_numbers<[1], [0], [0], [1], [0, 0, 1, 1], [], []>} : vector<2x32xf32>, vector<32x96xf32>, vector<2x96xf32> -> vector<2x96xf32>
    %423 = vector.extract_strided_slice %272 {offsets = [0, 5, 0], sizes = [2, 1, 96], strides = [1, 1, 1]} : vector<2x8x96xf32> to vector<2x1x96xf32>
    %424 = vector.shape_cast %423 : vector<2x1x96xf32> to vector<2x96xf32>
    %425 = vector.extract_strided_slice %424 {offsets = [0, 0], sizes = [2, 32], strides = [1, 1]} : vector<2x96xf32> to vector<2x32xf32>
    %426 = vector.extract_strided_slice %422 {offsets = [0, 0], sizes = [2, 32], strides = [1, 1]} : vector<2x96xf32> to vector<2x32xf32>
    %427 = arith.addf %425, %426 : vector<2x32xf32>
    %428 = arith.negf %427 : vector<2x32xf32>
    %429 = math.exp %428 : vector<2x32xf32>
    %cst_74 = arith.constant 1.000000e+00 : f32
    %430 = vector.broadcast %cst_74 : f32 to vector<2x32xf32>
    %431 = arith.addf %430, %429 : vector<2x32xf32>
    %432 = arith.divf %430, %431 : vector<2x32xf32>
    %433 = vector.extract_strided_slice %424 {offsets = [0, 32], sizes = [2, 32], strides = [1, 1]} : vector<2x96xf32> to vector<2x32xf32>
    %434 = vector.extract_strided_slice %422 {offsets = [0, 32], sizes = [2, 32], strides = [1, 1]} : vector<2x96xf32> to vector<2x32xf32>
    %435 = arith.addf %433, %434 : vector<2x32xf32>
    %436 = arith.negf %435 : vector<2x32xf32>
    %437 = math.exp %436 : vector<2x32xf32>
    %cst_75 = arith.constant 1.000000e+00 : f32
    %438 = vector.broadcast %cst_75 : f32 to vector<2x32xf32>
    %439 = arith.addf %438, %437 : vector<2x32xf32>
    %440 = arith.divf %438, %439 : vector<2x32xf32>
    %441 = vector.extract_strided_slice %424 {offsets = [0, 64], sizes = [2, 32], strides = [1, 1]} : vector<2x96xf32> to vector<2x32xf32>
    %442 = vector.extract_strided_slice %422 {offsets = [0, 64], sizes = [2, 32], strides = [1, 1]} : vector<2x96xf32> to vector<2x32xf32>
    %443 = vector.broadcast %276 : vector<1x32xf32> to vector<2x32xf32>
    %444 = arith.addf %442, %443 : vector<2x32xf32>
    %445 = arith.mulf %432, %444 : vector<2x32xf32>
    %446 = arith.addf %441, %445 : vector<2x32xf32>
    %447 = math.tanh %446 : vector<2x32xf32>
    %448 = arith.subf %421, %447 : vector<2x32xf32>
    %449 = arith.mulf %440, %448 : vector<2x32xf32>
    %450 = arith.addf %447, %449 : vector<2x32xf32>
    %cst_76 = arith.constant dense<0.000000e+00> : vector<2x96xf32>
    %451 = tpu.matmul %450, %274, %cst_76 {dimension_numbers = #tpu.dot_dimension_numbers<[1], [0], [0], [1], [0, 0, 1, 1], [], []>} : vector<2x32xf32>, vector<32x96xf32>, vector<2x96xf32> -> vector<2x96xf32>
    %452 = vector.extract_strided_slice %272 {offsets = [0, 6, 0], sizes = [2, 1, 96], strides = [1, 1, 1]} : vector<2x8x96xf32> to vector<2x1x96xf32>
    %453 = vector.shape_cast %452 : vector<2x1x96xf32> to vector<2x96xf32>
    %454 = vector.extract_strided_slice %453 {offsets = [0, 0], sizes = [2, 32], strides = [1, 1]} : vector<2x96xf32> to vector<2x32xf32>
    %455 = vector.extract_strided_slice %451 {offsets = [0, 0], sizes = [2, 32], strides = [1, 1]} : vector<2x96xf32> to vector<2x32xf32>
    %456 = arith.addf %454, %455 : vector<2x32xf32>
    %457 = arith.negf %456 : vector<2x32xf32>
    %458 = math.exp %457 : vector<2x32xf32>
    %cst_77 = arith.constant 1.000000e+00 : f32
    %459 = vector.broadcast %cst_77 : f32 to vector<2x32xf32>
    %460 = arith.addf %459, %458 : vector<2x32xf32>
    %461 = arith.divf %459, %460 : vector<2x32xf32>
    %462 = vector.extract_strided_slice %453 {offsets = [0, 32], sizes = [2, 32], strides = [1, 1]} : vector<2x96xf32> to vector<2x32xf32>
    %463 = vector.extract_strided_slice %451 {offsets = [0, 32], sizes = [2, 32], strides = [1, 1]} : vector<2x96xf32> to vector<2x32xf32>
    %464 = arith.addf %462, %463 : vector<2x32xf32>
    %465 = arith.negf %464 : vector<2x32xf32>
    %466 = math.exp %465 : vector<2x32xf32>
    %cst_78 = arith.constant 1.000000e+00 : f32
    %467 = vector.broadcast %cst_78 : f32 to vector<2x32xf32>
    %468 = arith.addf %467, %466 : vector<2x32xf32>
    %469 = arith.divf %467, %468 : vector<2x32xf32>
    %470 = vector.extract_strided_slice %453 {offsets = [0, 64], sizes = [2, 32], strides = [1, 1]} : vector<2x96xf32> to vector<2x32xf32>
    %471 = vector.extract_strided_slice %451 {offsets = [0, 64], sizes = [2, 32], strides = [1, 1]} : vector<2x96xf32> to vector<2x32xf32>
    %472 = vector.broadcast %276 : vector<1x32xf32> to vector<2x32xf32>
    %473 = arith.addf %471, %472 : vector<2x32xf32>
    %474 = arith.mulf %461, %473 : vector<2x32xf32>
    %475 = arith.addf %470, %474 : vector<2x32xf32>
    %476 = math.tanh %475 : vector<2x32xf32>
    %477 = arith.subf %450, %476 : vector<2x32xf32>
    %478 = arith.mulf %469, %477 : vector<2x32xf32>
    %479 = arith.addf %476, %478 : vector<2x32xf32>
    %cst_79 = arith.constant dense<0.000000e+00> : vector<2x96xf32>
    %480 = tpu.matmul %479, %274, %cst_79 {dimension_numbers = #tpu.dot_dimension_numbers<[1], [0], [0], [1], [0, 0, 1, 1], [], []>} : vector<2x32xf32>, vector<32x96xf32>, vector<2x96xf32> -> vector<2x96xf32>
    %481 = vector.extract_strided_slice %272 {offsets = [0, 7, 0], sizes = [2, 1, 96], strides = [1, 1, 1]} : vector<2x8x96xf32> to vector<2x1x96xf32>
    %482 = vector.shape_cast %481 : vector<2x1x96xf32> to vector<2x96xf32>
    %483 = vector.extract_strided_slice %482 {offsets = [0, 0], sizes = [2, 32], strides = [1, 1]} : vector<2x96xf32> to vector<2x32xf32>
    %484 = vector.extract_strided_slice %480 {offsets = [0, 0], sizes = [2, 32], strides = [1, 1]} : vector<2x96xf32> to vector<2x32xf32>
    %485 = arith.addf %483, %484 : vector<2x32xf32>
    %486 = arith.negf %485 : vector<2x32xf32>
    %487 = math.exp %486 : vector<2x32xf32>
    %cst_80 = arith.constant 1.000000e+00 : f32
    %488 = vector.broadcast %cst_80 : f32 to vector<2x32xf32>
    %489 = arith.addf %488, %487 : vector<2x32xf32>
    %490 = arith.divf %488, %489 : vector<2x32xf32>
    %491 = vector.extract_strided_slice %482 {offsets = [0, 32], sizes = [2, 32], strides = [1, 1]} : vector<2x96xf32> to vector<2x32xf32>
    %492 = vector.extract_strided_slice %480 {offsets = [0, 32], sizes = [2, 32], strides = [1, 1]} : vector<2x96xf32> to vector<2x32xf32>
    %493 = arith.addf %491, %492 : vector<2x32xf32>
    %494 = arith.negf %493 : vector<2x32xf32>
    %495 = math.exp %494 : vector<2x32xf32>
    %cst_81 = arith.constant 1.000000e+00 : f32
    %496 = vector.broadcast %cst_81 : f32 to vector<2x32xf32>
    %497 = arith.addf %496, %495 : vector<2x32xf32>
    %498 = arith.divf %496, %497 : vector<2x32xf32>
    %499 = vector.extract_strided_slice %482 {offsets = [0, 64], sizes = [2, 32], strides = [1, 1]} : vector<2x96xf32> to vector<2x32xf32>
    %500 = vector.extract_strided_slice %480 {offsets = [0, 64], sizes = [2, 32], strides = [1, 1]} : vector<2x96xf32> to vector<2x32xf32>
    %501 = vector.broadcast %276 : vector<1x32xf32> to vector<2x32xf32>
    %502 = arith.addf %500, %501 : vector<2x32xf32>
    %503 = arith.mulf %490, %502 : vector<2x32xf32>
    %504 = arith.addf %499, %503 : vector<2x32xf32>
    %505 = math.tanh %504 : vector<2x32xf32>
    %506 = arith.subf %479, %505 : vector<2x32xf32>
    %507 = arith.mulf %498, %506 : vector<2x32xf32>
    %508 = arith.addf %505, %507 : vector<2x32xf32>
    %509 = vector.shape_cast %305 : vector<2x32xf32> to vector<2x1x32xf32>
    %510 = vector.shape_cast %334 : vector<2x32xf32> to vector<2x1x32xf32>
    %511 = vector.shape_cast %363 : vector<2x32xf32> to vector<2x1x32xf32>
    %512 = vector.shape_cast %392 : vector<2x32xf32> to vector<2x1x32xf32>
    %513 = vector.shape_cast %421 : vector<2x32xf32> to vector<2x1x32xf32>
    %514 = vector.shape_cast %450 : vector<2x32xf32> to vector<2x1x32xf32>
    %515 = vector.shape_cast %479 : vector<2x32xf32> to vector<2x1x32xf32>
    %516 = vector.shape_cast %508 : vector<2x32xf32> to vector<2x1x32xf32>
    %517 = tpu.concatenate %509, %510, %511, %512, %513, %514, %515, %516 in 1 : vector<2x1x32xf32>, vector<2x1x32xf32>, vector<2x1x32xf32>, vector<2x1x32xf32>, vector<2x1x32xf32>, vector<2x1x32xf32>, vector<2x1x32xf32>, vector<2x1x32xf32> -> vector<2x8x32xf32>
    %518 = vector.shape_cast %517 : vector<2x8x32xf32> to vector<16x32xf32>
    %c0_82 = arith.constant 0 : index
    %c0_83 = arith.constant 0 : index
    %519 = vector.load %arg7[%c0_82, %c0_83] : memref<32x16xf32, #tpu.memory_space<vmem>>, vector<32x16xf32>
    %cst_84 = arith.constant dense<0.000000e+00> : vector<16x16xf32>
    %520 = tpu.matmul %518, %519, %cst_84 {dimension_numbers = #tpu.dot_dimension_numbers<[1], [0], [0], [1], [0, 0, 1, 1], [], []>} : vector<16x32xf32>, vector<32x16xf32>, vector<16x16xf32> -> vector<16x16xf32>
    %c0_85 = arith.constant 0 : index
    %c0_86 = arith.constant 0 : index
    %521 = vector.load %arg8[%c0_85, %c0_86] : memref<16x16xf32, #tpu.memory_space<vmem>>, vector<16x16xf32>
    tpu.vector_store %arg8[%c0_85, %c0_86], %520 {strides = array<i32>} : memref<16x16xf32, #tpu.memory_space<vmem>>, vector<16x16xf32>,
    return
  }
}

</mosaic_0001>

<bundles_post_ra>
// kernel: forward.1
= control target key start
LH: loop header
LB: loop body
LE: loop exit
PB: predicated region body
PF: predicated region fallthrough
CT: control target
= control target key end

     0   :  { %15 = vsyncpa [#allocation3], 0  ;;  %s4509_s0 = inlined_call_operand.vmem [shape: s32[16,1], index: 0, kind: input, shape index: {}]   ;;  %s4510_s1 = inlined_call_operand.vmem [shape: f32[2,32], index: 1, kind: input, shape index: {}]   ;;  %s4511_s2 = inlined_call_operand.vmem [shape: f32[16,32], index: 2, kind: input, shape index: {}]   ;;  %s4512_s3 = inlined_call_operand.vmem [shape: f32[2,32,96], index: 3, kind: input, shape index: {}]   ;;  %s4513_s4 = inlined_call_operand.hbm [shape: f32[2,32,96], index: 4, kind: input, shape index: {}]   ;;  %s4514_s5 = inlined_call_operand.vmem [shape: f32[2,1,96], index: 5, kind: input, shape index: {}]   ;;  %s4515_s6 = inlined_call_operand.hbm [shape: f32[2,1,32], index: 6, kind: input, shape index: {}]   ;;  %s4516_s7 = inlined_call_operand.vmem [shape: f32[32,16], index: 7, kind: input, shape index: {}]   ;;  %s4517_s8 = inlined_call_operand.hbm [shape: f32[16,16], index: 8, kind: output, shape index: {0}]   ;;  %s4518_s9 = inlined_call_operand.hbm [shape: f32[16,32], index: 9, kind: output, shape index: {1}]  }
   0x1   :  { %16 = vsyncpa [#allocation6], 0 }
   0x2   :  { %17 = vsyncpa [#allocation4], 0 }
   0x3   :  { %18 = vsyncpa [#allocation9], 0  ;;  %s3755_s30 = smov [#allocation2]   ;;  %s3659_s13 = scalar_lea.hbm %s4513_s4, 1024 }
   0x4   :  { %s32_s10 = sshll.u32 %s3755_s30, 4  ;;  %p3660_p0 = scmp.ne.s32.totalorder %s4513_s4, %s3659_s13  ;;  %s33_s10 = int_to_ptr.vmem [resolvable:$true] %s32_s10 }
   0x5   :  { %p3663_p1 = scmp.lt.u32.totalorder %s3659_s13, %s4513_s4 }
   0x7   :  { %p3665_p2 = pnand %p3663_p1, %p3660_p0 }
   0x9   :  { %3668 = shalt.err (!%p3665_p2)
}
   0xa   :  { %s3669_s18 = scalar_lea.vmem %s33_s10, 1024  ;;  %p3674_p4 = scmp.lt.s32.totalorder %s33_s10, %s33_s10 }
   0xb   :  { %p3670_p3 = scmp.ne.s32.totalorder %s33_s10, %s3669_s18  ;;  %p3675_p5 = scmp.lt.s32.totalorder %s3669_s18, %s3669_s18 }
   0xd   :  { %p3676_p6 = por %p3675_p5, %p3674_p4 }
   0xf   :  { %p3677_p7 = pnand %p3676_p6, %p3670_p3 }
  0x11   :  { %3680 = shalt.err (!%p3677_p7)
}
  0x12   :  { %s3756_s19 = smov 128   ;;  %s3757_s20 = smov 8  }
  0x13   :  { %38 = dma.hbm_to_vmem [thread:$0]  %s4513_s4, 1024, %s33_s10, [#allocation3], %s3756_s19, %s3756_s19, %s3757_s20  }
  0x14   :  { %s3758_s23 = smov [#allocation5]   ;;  %s3681_s27 = scalar_lea.hbm %s4515_s6, 32 }
  0x15   :  { %s46_s24 = sshll.u32 %s3758_s23, 4  ;;  %p3682_p8 = scmp.ne.s32.totalorder %s4515_s6, %s3681_s27  ;;  %s47_s24 = int_to_ptr.vmem [resolvable:$true] %s46_s24 }
  0x16   :  { %p3685_p9 = scmp.lt.u32.totalorder %s3681_s27, %s4515_s6 }
  0x18   :  { %p3687_p10 = pnand %p3685_p9, %p3682_p8 }
  0x1a   :  { %3690 = shalt.err (!%p3687_p10)
}
  0x1b   :  { %s3691_s12 = scalar_lea.vmem %s47_s24, 32  ;;  %p3696_p12 = scmp.lt.s32.totalorder %s47_s24, %s47_s24 }
  0x1c   :  { %p3692_p11 = scmp.ne.s32.totalorder %s47_s24, %s3691_s12  ;;  %p3697_p13 = scmp.lt.s32.totalorder %s3691_s12, %s3691_s12 }
  0x1e   :  { %p3698_p0 = por %p3697_p13, %p3696_p12 }
  0x20   :  { %p3699_p1 = pnand %p3698_p0, %p3692_p11 }
  0x22   :  { %3702 = shalt.err (!%p3699_p1)
}
  0x23   :  { %s3759_s4 = smov 16   ;;  %s3760_s10 = smov 1  }
  0x24   :  { %52 = dma.hbm_to_vmem [thread:$0]  %s4515_s6, 32, %s47_s24, [#allocation6], %s3759_s4, %s3759_s4, %s3760_s10  }
  0x25   :  { %3747 = dma.done.wait [#allocation3], 1024  }
  0x26   :  { %3748 = vsyncadd [#allocation3], 4294966272 }
  0x27   :  { %3749 = dma.done.wait [#allocation6], 32  }
  0x28   :  { %3750 = vsyncadd [#allocation6], 4294967264  ;;  %v3761_v0 = vmov 0   ;;  %v61_v1 = vld [vmem:[%s4509_s0] sm:$0xff]  ;;  %v76_v3 = vld [vmem:[%s4511_s2 + $0x8] sm:$0xff]  ;;  %v3762_v6 = vmov 0.0|0.0   ;;  %v63_v13 = vlaneseq }
  0x29   :  { %3465 = vset.pattern.permute.xlu0 %v3761_v0  ;;  %v75_v2 = vld [vmem:[%s4511_s2] sm:$0xff]  ;;  %v62_v4 = vld [vmem:[%s4509_s0 + $0x8] sm:$0xff]  ;;  %v165_v9 = vld [vmem:[%s4512_s3 + $0x10] sm:$0xff]  ;;  %vm77_vm0 = vcmask 130048   ;;  %v3763_v18 = vmov 0.0   ;;  %vm3764_vm3 = vmmov 0  }
  0x2a   :  { %66 = vperm.xlu0 %3465, %v61_v1   ;;  %v3326_v5 = vpack.c.bf16 %v76_v3, %v75_v2  ;;  %v163_v7 = vld [vmem:[%s4512_s3] sm:$0xff]  ;;  %v164_v8 = vld [vmem:[%s4512_s3 + $0x8] sm:$0xff]  ;;  %v166_v11 = vld [vmem:[%s4512_s3 + $0x18] sm:$0xff]  ;;  %v64_v14 = vand.u32 127, %v63_v13  ;;  %vm159_vm4 = vcmask 261120   ;;  %s3765_s12 = smov 64  }
  0x2b   :  { %v3330_v10 = vpack.c.bf16 %v164_v8, %v163_v7  ;;  %v3334_v12 = vpack.c.bf16 %v166_v11, %v165_v9  ;;  %v255_v16 = vld [vmem:[#allocation2] sm:$0xff]  ;;  %v256_v17 = vld [vmem:[#allocation2 + $0x8] sm:$0xff]  ;;  %v257_v22 = vld [vmem:[#allocation2 + $0x10] sm:$0xff]  ;;  %vm385_vm5 = vcmask 1041409   ;;  %s3766_s13 = smov 32   ;;  %s3767_s14 = smov 96  }
  0x2c   :  { %3327 = vmatprep.subr.bf16.mxu0 %v3326_v5  ;;  %v3875_v21 = vpack.c.bf16 %v256_v17, %v255_v16  ;;  %v258_v23 = vld [vmem:[#allocation2 + $0x18] sm:$0xff]  ;;  %v3889_v26 = vld [vmem:[%s4510_s1] sm:$0x3]  ;;  %vm1471_vm6 = vcmask 1040384   ;;  %vm1474_vm7 = vcmask 1041408   ;;  %vm1477_vm8 = vcmask 1042432  }
  0x2d   :  { %3329 = vmatpush3.bf16.msra.mxu0 %v3326_v5  ;;  %3331 = vmatprep.subr.bf16.mxu1 %v3330_v10  ;;  %v3880_v25 = vpack.c.bf16 %v258_v23, %v257_v22  ;;  %v2951_v27 = vld [vmem:[#allocation5] ss:$0 sm:$0xff]  ;;  %vm1480_vm9 = vcmask 1043456   ;;  %vm1483_vm10 = vcmask 1044480   ;;  %vm1486_vm11 = vcmask 1045504  }
  0x2e   :  { %69 = vperm.xlu0 %3465, %v62_v4   ;;  %3338 = vmatprep.subr.bf16.mxu0 %v3762_v6  ;;  %v2945_v35 = vld [vmem:[%s4514_s5] ss:$0 sm:$0xff]  ;;  %vm1489_vm12 = vcmask 1046528  }
  0x2f   :  { %3333 = vmatpush3.bf16.msra.mxu1 %v3330_v10  ;;  %356 = vrot.lane.b32.xlu1 %v2951_v27, %s3765_s12 }
  0x30   :  { %3335 = vmatprep.subr.bf16.mxu1 %v3334_v12 }
  0x33   :  { %3337 = vmatpush3.bf16.msra.mxu1 %v3334_v12 }
  0x34   :  { %3344 = vmatprep.subr.bf16.mxu1 %v3762_v6 }
  0xa1   :  { %v3909_v30 = vpop.permute.xlu1 %356 }
  0xa9   :  { %v67_v15 = vpop.permute.xlu0 %66 }
  0xaa   :  { %vm71_vm1 = vcmp.eq.s32.totalorder %v64_v14, %v67_v15 }
  0xab   :  { %v73_v19 = vsel %vm71_vm1, 1.0, %v3763_v18 }
  0xac   :  { %3114 = vmatprep.mubr.msk.f32.mxu0 %vm77_vm0, %v73_v19 }
  0xad   :  { %v70_v20 = vpop.permute.xlu0 %69 }
  0xae   :  { %vm72_vm2 = vcmp.eq.s32.totalorder %v64_v14, %v70_v20 }
  0xaf   :  { %v74_v24 = vsel %vm72_vm2, 1.0, %v3763_v18 }
  0xb0   :  { %3115 = vmatmul.mubr.msk.f32.vlgmr.msra.gmra.mrb[0].mxu0 %vm77_vm0, %v74_v24 }
  0xb1   :  { %3340 = vmatpush3.bf16.msra.mxu0 %v3875_v21  ;;  %3136 = vmatprep.mubr.msk.f32.mxu0 %vm3764_vm3, %v3763_v18 }
  0xb2   :  { %3341 = vmatprep.subr.bf16.mxu0 %v3762_v6 }
  0xb5   :  { %3343 = vmatpush3.bf16.msra.mxu0 %v3880_v25 }
  0xb6   :  { %3350 = vmatprep.subr.bf16.mxu0 %v3762_v6 }
  0xb8   :  { %3137 = vmatmul.mubr.msk.f32.vlgmr.msra.gmra.mrb[2].mxu0 %vm159_vm4, %v3889_v26 }
  0xb9   :  { %3352 = vmatpush3.bf16.msra.mxu0 %v3875_v21  ;;  %3158 = vmatprep.mubr.msk.f32.mxu0 %vm3764_vm3, %v3763_v18 }
  0xba   :  { %3353 = vmatprep.subr.bf16.mxu0 %v3762_v6 }
  0xbd   :  { %3355 = vmatpush3.bf16.msra.mxu0 %v3880_v25 }
  0xbe   :  { %3362 = vmatprep.subr.bf16.mxu0 %v3762_v6 }
 0x183   :  { %v3116_v28 = vpop.f32.mrb[0].mxu0 }
 0x184   :  { %161 = vst.msk [vmem:[#allocation8 + $0x8] sm:$0xff] %vm159_vm4, %v3116_v28  ;;  %v150_v29 = vpop.f32.mrb[1].mxu0 }
 0x185   :  { %160 = vst.msk [vmem:[#allocation8] sm:$0xff] %vm159_vm4, %v150_v29  ;;  %3125 = vmatprep.mubr.msk.f32.mxu1 %vm159_vm4, %v150_v29 }
 0x186   :  { %3126 = vmatmul.mubr.msk.f32.vlgmr.msra.gmra.mrb[0].mxu1 %vm159_vm4, %v3116_v28 }
 0x187   :  { %3346 = vmatpush3.bf16.msra.mxu1 %v3875_v21  ;;  %3147 = vmatprep.mubr.msk.f32.mxu1 %vm3764_vm3, %v3763_v18 }
 0x188   :  { %3347 = vmatprep.subr.bf16.mxu1 %v3762_v6 }
 0x18b   :  { %v329_v31 = vpop.f32.mrb[2].mxu0  ;;  %3349 = vmatpush3.bf16.msra.mxu1 %v3880_v25 }
 0x18c   :  { %v3138_v32 = vpop.f32.mrb[3].mxu0  ;;  %v359_v33 = vadd.f32 %v3909_v30, %v329_v31  ;;  %3356 = vmatprep.subr.bf16.mxu1 %v3762_v6  ;;  %v334_v37 = vrot.slane %v329_v31, 1 }
 0x18e   :  { %362 = vrot.lane.b32.xlu0 %v359_v33, %s3765_s12  ;;  %v361_v34 = vrot.slane %v359_v33, 1 }
 0x190   :  { %364 = vrot.lane.b32.xlu1 %v361_v34, %s3765_s12 }
 0x200   :  { %v363_v52 = vpop.permute.xlu0 %362 }
 0x202   :  { %v365_v49 = vpop.permute.xlu1 %364 }
 0x259   :  { %v3127_v36 = vpop.f32.mrb[0].mxu1 }
 0x25a   :  { %v3919_v38 = vadd.f32 %v3127_v36, %v2945_v35  ;;  %v246_v39 = vpop.f32.mrb[1].mxu1 }
 0x25b   :  { %v3921_v40 = vadd.f32 %v2945_v35, %v246_v39 }
 0x25c   :  { %v338_v41 = vadd.f32 %v334_v37, %v3919_v38 }
 0x25d   :  { %v337_v42 = vadd.f32 %v329_v31, %v3921_v40 }
 0x25e   :  { %v2950_v43 = vmul.f32 -1.442695, %v338_v41 }
 0x25f   :  { %v2949_v44 = vmul.f32 -1.442695, %v337_v42 }
 0x260   :  { %3466 = vpow2.f32 %v2950_v43 }
 0x261   :  { %3468 = vpow2.f32 %v2949_v44 }
 0x26a   :  { %v3467_v45 = vpop.eup %3466 }
 0x26b   :  { %v3469_v46 = vpop.eup %3468  ;;  %v346_v47 = vadd.f32 1.0, %v3467_v45 }
 0x26c   :  { %v345_v48 = vadd.f32 1.0, %v3469_v46 }
 0x26d   :  { %3470 = vrcp.f32 %v346_v47 }
 0x26e   :  { %3472 = vrcp.f32 %v345_v48 }
 0x277   :  { %v3471_v50 = vpop.eup %3470 }
 0x278   :  { %v3473_v51 = vpop.eup %3472  ;;  %v369_v53 = vmul.f32 %v3471_v50, %v365_v49 }
 0x279   :  { %v368_v54 = vmul.f32 %v3473_v51, %v363_v52 }
 0x27a   :  { %374 = vrot.lane.b32.xlu1 %v369_v53, %s3765_s12 }
 0x27b   :  { %372 = vrot.lane.b32.xlu0 %v368_v54, %s3765_s12 }
 0x2ec   :  { %v375_v55 = vpop.permute.xlu1 %374 }
 0x2ed   :  { %v379_v56 = vadd.f32 %v375_v55, %v3919_v38  ;;  %v373_v57 = vpop.permute.xlu0 %372 }
 0x2ee   :  { %v378_v58 = vadd.f32 %v373_v57, %v3921_v40 }
 0x2ef   :  { %3474 = vtanh.f32 %v379_v56 }
 0x2f0   :  { %3476 = vtanh.f32 %v378_v58 }
 0x2f9   :  { %v3475_v59 = vpop.eup %3474 }
 0x2fa   :  { %v3477_v60 = vpop.eup %3476  ;;  %v384_v61 = vrot.slane %v3475_v59, 7 }
 0x2fc   :  { %v386_v62 = vsel %vm385_vm5, %v384_v61, %v3477_v60 }
 0x2fd   :  { %387 = vrot.lane.b32.xlu1 %v386_v62, %s3765_s12 }
 0x36f   :  { %v388_v63 = vpop.permute.xlu1 %387 }
 0x370   :  { %v390_v0 = vsub.f32 %v3889_v26, %v388_v63 }
 0x372   :  { %v392_v1 = vrot.slane %v390_v0, 1  ;;  %393 = vrot.lane.b32.xlu1 %v390_v0, %s3766_s13 }
 0x374   :  { %395 = vrot.lane.b32.xlu0 %v392_v1, %s3766_s13 }
 0x3e4   :  { %v394_v2 = vpop.permute.xlu1 %393 }
 0x3e5   :  { %v399_v3 = vmul.f32 %v3473_v51, %v394_v2 }
 0x3e6   :  { %v396_v4 = vpop.permute.xlu0 %395 }
 0x3e7   :  { %v400_v5 = vmul.f32 %v3471_v50, %v396_v4  ;;  %403 = vrot.lane.b32.xlu1 %v399_v3, %s3766_s13 }
 0x3e9   :  { %405 = vrot.lane.b32.xlu0 %v400_v5, %s3766_s13 }
 0x459   :  { %v404_v7 = vpop.permute.xlu1 %403 }
 0x45a   :  { %v3938_v10 = vadd.f32 %v3477_v60, %v404_v7 }
 0x45b   :  { %v406_v8 = vpop.permute.xlu0 %405 }
 0x45c   :  { %v3936_v9 = vadd.f32 %v3475_v59, %v406_v8 }
 0x45e   :  { %v413_v11 = vrot.slane %v3936_v9, 7 }
 0x460   :  { %v414_v12 = vsel %vm385_vm5, %v413_v11, %v3938_v10 }
 0x461   :  { %415 = vrot.lane.b32.xlu0 %v414_v12, %s3765_s12 }
 0x4d3   :  { %v416_v13 = vpop.permute.xlu0 %415 }
 0x4d4   :  { %3148 = vmatmul.mubr.msk.f32.vlgmr.msra.gmra.mrb[2].mxu1 %vm159_vm4, %v416_v13 }
 0x4d5   :  { %3358 = vmatpush3.bf16.msra.mxu1 %v3875_v21  ;;  %3169 = vmatprep.mubr.msk.f32.mxu1 %vm3764_vm3, %v3763_v18 }
 0x4d6   :  { %3359 = vmatprep.subr.bf16.mxu1 %v3762_v6 }
 0x4d9   :  { %3361 = vmatpush3.bf16.msra.mxu1 %v3880_v25 }
 0x4da   :  { %3368 = vmatprep.subr.bf16.mxu1 %v3762_v6 }
 0x5a7   :  { %v485_v14 = vpop.f32.mrb[2].mxu1 }
 0x5a8   :  { %v507_v15 = vadd.f32 %v485_v14, %v3909_v30  ;;  %v3149_v16 = vpop.f32.mrb[3].mxu1  ;;  %v490_v19 = vrot.slane %v485_v14, 7  ;;  %v494_v20 = vadd.f32 %v485_v14, %v3919_v38 }
 0x5aa   :  { %512 = vrot.lane.b32.xlu0 %v507_v15, %s3765_s12  ;;  %v509_v17 = vrot.slane %v507_v15, 7  ;;  %v493_v22 = vadd.f32 %v490_v19, %v3921_v40  ;;  %v2954_v23 = vmul.f32 -1.442695, %v494_v20 }
 0x5ac   :  { %510 = vrot.lane.b32.xlu1 %v509_v17, %s3765_s12  ;;  %v2953_v24 = vmul.f32 -1.442695, %v493_v22  ;;  %3478 = vpow2.f32 %v2954_v23 }
 0x5ae   :  { %3480 = vpow2.f32 %v2953_v24 }
 0x5b6   :  { %v3479_v26 = vpop.eup %3478 }
 0x5b7   :  { %v502_v28 = vadd.f32 1.0, %v3479_v26 }
 0x5b8   :  { %v3481_v27 = vpop.eup %3480 }
 0x5b9   :  { %v501_v29 = vadd.f32 1.0, %v3481_v27  ;;  %3482 = vrcp.f32 %v502_v28 }
 0x5bb   :  { %3484 = vrcp.f32 %v501_v29 }
 0x5c3   :  { %v3483_v31 = vpop.eup %3482 }
 0x5c5   :  { %v3485_v34 = vpop.eup %3484 }
 0x61c   :  { %v513_v32 = vpop.permute.xlu0 %512 }
 0x61d   :  { %v517_v33 = vmul.f32 %v3483_v31, %v513_v32 }
 0x61e   :  { %v511_v35 = vpop.permute.xlu1 %510 }
 0x61f   :  { %v516_v36 = vmul.f32 %v3485_v34, %v511_v35  ;;  %522 = vrot.lane.b32.xlu0 %v517_v33, %s3765_s12 }
 0x621   :  { %520 = vrot.lane.b32.xlu1 %v516_v36, %s3765_s12 }
 0x691   :  { %v523_v37 = vpop.permute.xlu0 %522 }
 0x692   :  { %v527_v39 = vadd.f32 %v523_v37, %v3919_v38 }
 0x693   :  { %v521_v41 = vpop.permute.xlu1 %520 }
 0x694   :  { %3486 = vtanh.f32 %v527_v39  ;;  %v526_v42 = vadd.f32 %v521_v41, %v3921_v40 }
 0x696   :  { %3488 = vtanh.f32 %v526_v42 }
 0x69e   :  { %v3487_v43 = vpop.eup %3486 }
 0x69f   :  { %v533_v44 = vrot.slane %v3487_v43, 1 }
 0x6a0   :  { %v3489_v45 = vpop.eup %3488 }
 0x6a1   :  { %v537_v46 = vsub.f32 %v3936_v9, %v533_v44  ;;  %v532_v47 = vrot.slane %v3489_v45, 1 }
 0x6a3   :  { %v541_v48 = vrot.slane %v537_v46, 7  ;;  %v536_v49 = vsub.f32 %v3938_v10, %v532_v47 }
 0x6a5   :  { %544 = vrot.lane.b32.xlu0 %v541_v48, %s3767_s14  ;;  %v540_v50 = vrot.slane %v536_v49, 7 }
 0x6a7   :  { %542 = vrot.lane.b32.xlu1 %v540_v50, %s3767_s14 }
 0x717   :  { %v545_v51 = vpop.permute.xlu0 %544 }
 0x718   :  { %v549_v52 = vmul.f32 %v3483_v31, %v545_v51 }
 0x719   :  { %v543_v53 = vpop.permute.xlu1 %542 }
 0x71a   :  { %v548_v54 = vmul.f32 %v3485_v34, %v543_v53  ;;  %554 = vrot.lane.b32.xlu0 %v549_v52, %s3766_s13 }
 0x71c   :  { %552 = vrot.lane.b32.xlu1 %v548_v54, %s3766_s13 }
 0x78c   :  { %v555_v55 = vpop.permute.xlu0 %554 }
 0x78d   :  { %v3968_v58 = vadd.f32 %v3487_v43, %v555_v55 }
 0x78e   :  { %v553_v56 = vpop.permute.xlu1 %552 }
 0x78f   :  { %v3966_v57 = vadd.f32 %v3489_v45, %v553_v56 }
 0x791   :  { %v562_v59 = vrot.slane %v3966_v57, 1 }
 0x793   :  { %v563_v60 = vsel %vm385_vm5, %v3968_v58, %v562_v59 }
 0x794   :  { %564 = vrot.lane.b32.xlu1 %v563_v60, %s3765_s12 }
 0x806   :  { %v565_v61 = vpop.permute.xlu1 %564 }
 0x807   :  { %3159 = vmatmul.mubr.msk.f32.vlgmr.msra.gmra.mrb[4].mxu0 %vm159_vm4, %v565_v61 }
 0x808   :  { %3364 = vmatpush3.bf16.msra.mxu0 %v3875_v21  ;;  %3180 = vmatprep.mubr.msk.f32.mxu0 %vm3764_vm3, %v3763_v18 }
 0x809   :  { %3365 = vmatprep.subr.bf16.mxu0 %v3762_v6 }
 0x80c   :  { %3367 = vmatpush3.bf16.msra.mxu0 %v3880_v25 }
 0x80d   :  { %3374 = vmatprep.subr.bf16.mxu0 %v3762_v6 }
 0x8da   :  { %v634_v62 = vpop.f32.mrb[4].mxu0 }
 0x8db   :  { %v657_v63 = vadd.f32 %v634_v62, %v3909_v30  ;;  %v3160_v0 = vpop.f32.mrb[5].mxu0  ;;  %v639_v3 = vrot.slane %v634_v62, 6  ;;  %v640_v4 = vrot.slane %v634_v62, 7 }
 0x8dd   :  { %v660_v1 = vrot.slane %v657_v63, 7  ;;  %v659_v2 = vrot.slane %v657_v63, 6  ;;  %v643_v5 = vadd.f32 %v639_v3, %v3921_v40  ;;  %v644_v7 = vadd.f32 %v640_v4, %v3919_v38 }
 0x8df   :  { %663 = vrot.lane.b32.xlu1 %v660_v1, %s3765_s12  ;;  %661 = vrot.lane.b32.xlu0 %v659_v2, %s3765_s12  ;;  %v2956_v8 = vmul.f32 -1.442695, %v643_v5  ;;  %v2957_v11 = vmul.f32 -1.442695, %v644_v7 }
 0x8e1   :  { %3490 = vpow2.f32 %v2956_v8 }
 0x8e2   :  { %3492 = vpow2.f32 %v2957_v11 }
 0x8eb   :  { %v3491_v12 = vpop.eup %3490 }
 0x8ec   :  { %v3493_v13 = vpop.eup %3492  ;;  %v651_v14 = vadd.f32 1.0, %v3491_v12 }
 0x8ed   :  { %v652_v15 = vadd.f32 1.0, %v3493_v13 }
 0x8ee   :  { %3494 = vrcp.f32 %v651_v14 }
 0x8ef   :  { %3496 = vrcp.f32 %v652_v15 }
 0x8f8   :  { %v3495_v16 = vpop.eup %3494 }
 0x8f9   :  { %v3497_v17 = vpop.eup %3496 }
 0x951   :  { %v664_v19 = vpop.permute.xlu1 %663  ;;  %v662_v20 = vpop.permute.xlu0 %661 }
 0x952   :  { %v668_v22 = vmul.f32 %v3497_v17, %v664_v19  ;;  %v667_v23 = vmul.f32 %v3495_v16, %v662_v20 }
 0x954   :  { %673 = vrot.lane.b32.xlu1 %v668_v22, %s3765_s12  ;;  %671 = vrot.lane.b32.xlu0 %v667_v23, %s3765_s12 }
 0x9c6   :  { %v674_v24 = vpop.permute.xlu1 %673  ;;  %v672_v26 = vpop.permute.xlu0 %671 }
 0x9c7   :  { %v678_v27 = vadd.f32 %v674_v24, %v3919_v38  ;;  %v677_v28 = vadd.f32 %v672_v26, %v3921_v40 }
 0x9c9   :  { %3498 = vtanh.f32 %v678_v27 }
 0x9ca   :  { %3500 = vtanh.f32 %v677_v28 }
 0x9d3   :  { %v3499_v29 = vpop.eup %3498 }
 0x9d4   :  { %v3501_v31 = vpop.eup %3500  ;;  %v684_v32 = vrot.slane %v3499_v29, 1 }
 0x9d5   :  { %v683_v33 = vrot.slane %v3501_v31, 1 }
 0x9d6   :  { %v688_v34 = vsub.f32 %v3968_v58, %v684_v32 }
 0x9d7   :  { %v687_v35 = vsub.f32 %v3966_v57, %v683_v33 }
 0x9d8   :  { %v692_v36 = vrot.slane %v688_v34, 7 }
 0x9d9   :  { %v691_v37 = vrot.slane %v687_v35, 7 }
 0x9da   :  { %695 = vrot.lane.b32.xlu1 %v692_v36, %s3767_s14 }
 0x9db   :  { %693 = vrot.lane.b32.xlu0 %v691_v37, %s3767_s14 }
 0xa4c   :  { %v696_v39 = vpop.permute.xlu1 %695 }
 0xa4d   :  { %v700_v41 = vmul.f32 %v3497_v17, %v696_v39  ;;  %v694_v42 = vpop.permute.xlu0 %693 }
 0xa4e   :  { %v699_v43 = vmul.f32 %v3495_v16, %v694_v42 }
 0xa4f   :  { %705 = vrot.lane.b32.xlu1 %v700_v41, %s3766_s13 }
 0xa50   :  { %703 = vrot.lane.b32.xlu0 %v699_v43, %s3766_s13 }
 0xac1   :  { %v706_v44 = vpop.permute.xlu1 %705 }
 0xac2   :  { %v3996_v45 = vadd.f32 %v3499_v29, %v706_v44  ;;  %v704_v46 = vpop.permute.xlu0 %703 }
 0xac3   :  { %v3998_v47 = vadd.f32 %v3501_v31, %v704_v46 }
 0xac4   :  { %v714_v48 = vrot.slane %v3996_v45, 1 }
 0xac5   :  { %v713_v49 = vrot.slane %v3998_v47, 2 }
 0xac7   :  { %v715_v50 = vsel %vm385_vm5, %v714_v48, %v713_v49 }
 0xac8   :  { %716 = vrot.lane.b32.xlu0 %v715_v50, %s3765_s12 }
 0xb3a   :  { %v717_v51 = vpop.permute.xlu0 %716 }
 0xb3b   :  { %3170 = vmatmul.mubr.msk.f32.vlgmr.msra.gmra.mrb[4].mxu1 %vm159_vm4, %v717_v51 }
 0xb3c   :  { %3370 = vmatpush3.bf16.msra.mxu1 %v3875_v21  ;;  %3191 = vmatprep.mubr.msk.f32.mxu1 %vm3764_vm3, %v3763_v18 }
 0xb3d   :  { %3371 = vmatprep.subr.bf16.mxu1 %v3762_v6 }
 0xb40   :  { %3373 = vmatpush3.bf16.msra.mxu1 %v3880_v25 }
 0xb41   :  { %3380 = vmatprep.subr.bf16.mxu1 %v3762_v6 }
 0xc0e   :  { %v786_v52 = vpop.f32.mrb[4].mxu1 }
 0xc0f   :  { %v809_v53 = vadd.f32 %v786_v52, %v3909_v30  ;;  %v3171_v54 = vpop.f32.mrb[5].mxu1  ;;  %v791_v59 = vrot.slane %v786_v52, 5  ;;  %v792_v60 = vrot.slane %v786_v52, 6 }
 0xc11   :  { %v812_v55 = vrot.slane %v809_v53, 6  ;;  %v811_v56 = vrot.slane %v809_v53, 5  ;;  %v795_v61 = vadd.f32 %v791_v59, %v3921_v40  ;;  %v796_v62 = vadd.f32 %v792_v60, %v3919_v38 }
 0xc13   :  { %815 = vrot.lane.b32.xlu0 %v812_v55, %s3765_s12  ;;  %813 = vrot.lane.b32.xlu1 %v811_v56, %s3765_s12  ;;  %v2959_v63 = vmul.f32 -1.442695, %v795_v61  ;;  %v2960_v0 = vmul.f32 -1.442695, %v796_v62 }
 0xc15   :  { %3502 = vpow2.f32 %v2959_v63 }
 0xc16   :  { %3504 = vpow2.f32 %v2960_v0 }
 0xc1f   :  { %v3503_v1 = vpop.eup %3502 }
 0xc20   :  { %v3505_v2 = vpop.eup %3504  ;;  %v803_v3 = vadd.f32 1.0, %v3503_v1 }
 0xc21   :  { %v804_v4 = vadd.f32 1.0, %v3505_v2 }
 0xc22   :  { %3506 = vrcp.f32 %v803_v3 }
 0xc23   :  { %3508 = vrcp.f32 %v804_v4 }
 0xc2c   :  { %v3507_v5 = vpop.eup %3506 }
 0xc2d   :  { %v3509_v7 = vpop.eup %3508 }
 0xc85   :  { %v816_v8 = vpop.permute.xlu0 %815  ;;  %v814_v11 = vpop.permute.xlu1 %813 }
 0xc86   :  { %v820_v12 = vmul.f32 %v3509_v7, %v816_v8  ;;  %v819_v13 = vmul.f32 %v3507_v5, %v814_v11 }
 0xc88   :  { %825 = vrot.lane.b32.xlu0 %v820_v12, %s3765_s12  ;;  %823 = vrot.lane.b32.xlu1 %v819_v13, %s3765_s12 }
 0xcfa   :  { %v826_v14 = vpop.permute.xlu0 %825  ;;  %v824_v15 = vpop.permute.xlu1 %823 }
 0xcfb   :  { %v830_v16 = vadd.f32 %v826_v14, %v3919_v38  ;;  %v829_v17 = vadd.f32 %v824_v15, %v3921_v40 }
 0xcfd   :  { %3510 = vtanh.f32 %v830_v16 }
 0xcfe   :  { %3512 = vtanh.f32 %v829_v17 }
 0xd07   :  { %v3511_v19 = vpop.eup %3510 }
 0xd08   :  { %v3513_v20 = vpop.eup %3512  ;;  %v836_v22 = vrot.slane %v3511_v19, 1 }
 0xd09   :  { %v835_v23 = vrot.slane %v3513_v20, 1 }
 0xd0a   :  { %v840_v24 = vsub.f32 %v3996_v45, %v836_v22 }
 0xd0b   :  { %v839_v26 = vsub.f32 %v3998_v47, %v835_v23 }
 0xd0c   :  { %v844_v27 = vrot.slane %v840_v24, 7 }
 0xd0d   :  { %v843_v28 = vrot.slane %v839_v26, 7 }
 0xd0e   :  { %847 = vrot.lane.b32.xlu0 %v844_v27, %s3767_s14 }
 0xd0f   :  { %845 = vrot.lane.b32.xlu1 %v843_v28, %s3767_s14 }
 0xd80   :  { %v848_v29 = vpop.permute.xlu0 %847 }
 0xd81   :  { %v852_v31 = vmul.f32 %v3509_v7, %v848_v29  ;;  %v846_v32 = vpop.permute.xlu1 %845 }
 0xd82   :  { %v851_v33 = vmul.f32 %v3507_v5, %v846_v32 }
 0xd83   :  { %857 = vrot.lane.b32.xlu0 %v852_v31, %s3766_s13 }
 0xd84   :  { %855 = vrot.lane.b32.xlu1 %v851_v33, %s3766_s13 }
 0xdf5   :  { %v858_v34 = vpop.permute.xlu0 %857 }
 0xdf6   :  { %v4026_v35 = vadd.f32 %v3511_v19, %v858_v34  ;;  %v856_v36 = vpop.permute.xlu1 %855 }
 0xdf7   :  { %v4028_v37 = vadd.f32 %v3513_v20, %v856_v36 }
 0xdf8   :  { %v866_v39 = vrot.slane %v4026_v35, 2 }
 0xdf9   :  { %v865_v41 = vrot.slane %v4028_v37, 3 }
 0xdfb   :  { %v867_v42 = vsel %vm385_vm5, %v866_v39, %v865_v41 }
 0xdfc   :  { %868 = vrot.lane.b32.xlu1 %v867_v42, %s3765_s12 }
 0xe6e   :  { %v869_v43 = vpop.permute.xlu1 %868 }
 0xe6f   :  { %3181 = vmatmul.mubr.msk.f32.vlgmr.msra.gmra.mrb[6].mxu0 %vm159_vm4, %v869_v43 }
 0xe70   :  { %3376 = vmatpush3.bf16.msra.mxu0 %v3875_v21  ;;  %3202 = vmatprep.mubr.msk.f32.mxu0 %vm3764_vm3, %v3763_v18 }
 0xe71   :  { %3377 = vmatprep.subr.bf16.mxu0 %v3762_v6 }
 0xe74   :  { %3379 = vmatpush3.bf16.msra.mxu0 %v3880_v25 }
 0xf42   :  { %v938_v44 = vpop.f32.mrb[6].mxu0 }
 0xf43   :  { %v961_v46 = vadd.f32 %v938_v44, %v3909_v30  ;;  %v3182_v48 = vpop.f32.mrb[7].mxu0  ;;  %v943_v51 = vrot.slane %v938_v44, 4  ;;  %v944_v52 = vrot.slane %v938_v44, 5 }
 0xf45   :  { %v964_v49 = vrot.slane %v961_v46, 5  ;;  %v963_v50 = vrot.slane %v961_v46, 4  ;;  %v947_v53 = vadd.f32 %v943_v51, %v3921_v40  ;;  %v948_v54 = vadd.f32 %v944_v52, %v3919_v38 }
 0xf47   :  { %967 = vrot.lane.b32.xlu1 %v964_v49, %s3765_s12  ;;  %965 = vrot.lane.b32.xlu0 %v963_v50, %s3765_s12  ;;  %v2962_v55 = vmul.f32 -1.442695, %v947_v53  ;;  %v2963_v56 = vmul.f32 -1.442695, %v948_v54 }
 0xf49   :  { %3514 = vpow2.f32 %v2962_v55 }
 0xf4a   :  { %3516 = vpow2.f32 %v2963_v56 }
 0xf53   :  { %v3515_v59 = vpop.eup %3514 }
 0xf54   :  { %v3517_v60 = vpop.eup %3516  ;;  %v955_v61 = vadd.f32 1.0, %v3515_v59 }
 0xf55   :  { %v956_v62 = vadd.f32 1.0, %v3517_v60 }
 0xf56   :  { %3518 = vrcp.f32 %v955_v61 }
 0xf57   :  { %3520 = vrcp.f32 %v956_v62 }
 0xf60   :  { %v3519_v63 = vpop.eup %3518 }
 0xf61   :  { %v3521_v0 = vpop.eup %3520 }
 0xfb9   :  { %v968_v1 = vpop.permute.xlu1 %967  ;;  %v966_v2 = vpop.permute.xlu0 %965 }
 0xfba   :  { %v972_v3 = vmul.f32 %v3521_v0, %v968_v1  ;;  %v971_v4 = vmul.f32 %v3519_v63, %v966_v2 }
 0xfbc   :  { %977 = vrot.lane.b32.xlu1 %v972_v3, %s3765_s12  ;;  %975 = vrot.lane.b32.xlu0 %v971_v4, %s3765_s12 }
0x102e   :  { %v978_v5 = vpop.permute.xlu1 %977  ;;  %v976_v7 = vpop.permute.xlu0 %975 }
0x102f   :  { %v982_v8 = vadd.f32 %v978_v5, %v3919_v38  ;;  %v981_v11 = vadd.f32 %v976_v7, %v3921_v40 }
0x1031   :  { %3522 = vtanh.f32 %v982_v8 }
0x1032   :  { %3524 = vtanh.f32 %v981_v11 }
0x103b   :  { %v3523_v12 = vpop.eup %3522 }
0x103c   :  { %v3525_v13 = vpop.eup %3524  ;;  %v988_v14 = vrot.slane %v3523_v12, 1 }
0x103d   :  { %v987_v15 = vrot.slane %v3525_v13, 1 }
0x103e   :  { %v992_v16 = vsub.f32 %v4026_v35, %v988_v14 }
0x103f   :  { %v991_v17 = vsub.f32 %v4028_v37, %v987_v15 }
0x1040   :  { %v996_v19 = vrot.slane %v992_v16, 7 }
0x1041   :  { %v995_v20 = vrot.slane %v991_v17, 7 }
0x1042   :  { %999 = vrot.lane.b32.xlu1 %v996_v19, %s3767_s14 }
0x1043   :  { %997 = vrot.lane.b32.xlu0 %v995_v20, %s3767_s14 }
0x10b4   :  { %v1000_v22 = vpop.permute.xlu1 %999 }
0x10b5   :  { %v1004_v23 = vmul.f32 %v3521_v0, %v1000_v22  ;;  %v998_v24 = vpop.permute.xlu0 %997 }
0x10b6   :  { %v1003_v26 = vmul.f32 %v3519_v63, %v998_v24 }
0x10b7   :  { %1009 = vrot.lane.b32.xlu1 %v1004_v23, %s3766_s13 }
0x10b8   :  { %1007 = vrot.lane.b32.xlu0 %v1003_v26, %s3766_s13 }
0x1129   :  { %v1010_v27 = vpop.permute.xlu1 %1009 }
0x112a   :  { %v4055_v28 = vadd.f32 %v3523_v12, %v1010_v27  ;;  %v1008_v29 = vpop.permute.xlu0 %1007 }
0x112b   :  { %v4057_v31 = vadd.f32 %v3525_v13, %v1008_v29 }
0x112c   :  { %v1018_v32 = vrot.slane %v4055_v28, 3 }
0x112d   :  { %v1017_v33 = vrot.slane %v4057_v31, 4 }
0x112f   :  { %v1019_v34 = vsel %vm385_vm5, %v1018_v32, %v1017_v33 }
0x1130   :  { %1020 = vrot.lane.b32.xlu0 %v1019_v34, %s3765_s12 }
0x11a2   :  { %v1021_v36 = vpop.permute.xlu0 %1020 }
0x11a3   :  { %3192 = vmatmul.mubr.msk.f32.vlgmr.msra.gmra.mrb[6].mxu1 %vm159_vm4, %v1021_v36 }
0x11a4   :  { %3382 = vmatpush3.bf16.msra.mxu1 %v3875_v21  ;;  %3213 = vmatprep.mubr.msk.f32.mxu1 %vm3764_vm3, %v3763_v18 }
0x11a5   :  { %3383 = vmatprep.subr.bf16.mxu1 %v3762_v6 }
0x11a8   :  { %3385 = vmatpush3.bf16.msra.mxu1 %v3880_v25 }
0x11a9   :  { %3394 = vmatprep.subr.bf16.mxu1 %v3762_v6 }
0x1276   :  { %v1090_v39 = vpop.f32.mrb[6].mxu1 }
0x1277   :  { %v1113_v41 = vadd.f32 %v1090_v39, %v3909_v30  ;;  %v3193_v42 = vpop.f32.mrb[7].mxu1  ;;  %v1095_v21 = vrot.slane %v1090_v39, 3  ;;  %v1096_v46 = vrot.slane %v1090_v39, 4 }
0x1279   :  { %v1116_v43 = vrot.slane %v1113_v41, 4  ;;  %v1115_v44 = vrot.slane %v1113_v41, 3  ;;  %v1099_v48 = vadd.f32 %v1095_v21, %v3921_v40  ;;  %v1100_v49 = vadd.f32 %v1096_v46, %v3919_v38 }
0x127b   :  { %1119 = vrot.lane.b32.xlu0 %v1116_v43, %s3765_s12  ;;  %1117 = vrot.lane.b32.xlu1 %v1115_v44, %s3765_s12  ;;  %v2965_v50 = vmul.f32 -1.442695, %v1099_v48  ;;  %v2966_v25 = vmul.f32 -1.442695, %v1100_v49 }
0x127d   :  { %3526 = vpow2.f32 %v2965_v50 }
0x127e   :  { %3528 = vpow2.f32 %v2966_v25 }
0x1287   :  { %v3527_v51 = vpop.eup %3526 }
0x1288   :  { %v3529_v52 = vpop.eup %3528  ;;  %v1107_v53 = vadd.f32 1.0, %v3527_v51 }
0x1289   :  { %v1108_v54 = vadd.f32 1.0, %v3529_v52 }
0x128a   :  { %3530 = vrcp.f32 %v1107_v53 }
0x128b   :  { %3532 = vrcp.f32 %v1108_v54 }
0x1294   :  { %v3531_v55 = vpop.eup %3530 }
0x1295   :  { %v3533_v56 = vpop.eup %3532 }
0x12ed   :  { %v1120_v59 = vpop.permute.xlu0 %1119  ;;  %v1118_v60 = vpop.permute.xlu1 %1117 }
0x12ee   :  { %v1124_v61 = vmul.f32 %v3533_v56, %v1120_v59  ;;  %v1123_v62 = vmul.f32 %v3531_v55, %v1118_v60 }
0x12f0   :  { %1129 = vrot.lane.b32.xlu0 %v1124_v61, %s3765_s12  ;;  %1127 = vrot.lane.b32.xlu1 %v1123_v62, %s3765_s12 }
0x1362   :  { %v1130_v63 = vpop.permute.xlu0 %1129  ;;  %v1128_v0 = vpop.permute.xlu1 %1127 }
0x1363   :  { %v1134_v1 = vadd.f32 %v1130_v63, %v3919_v38  ;;  %v1133_v2 = vadd.f32 %v1128_v0, %v3921_v40 }
0x1365   :  { %3534 = vtanh.f32 %v1134_v1 }
0x1366   :  { %3536 = vtanh.f32 %v1133_v2 }
0x136f   :  { %v3535_v3 = vpop.eup %3534 }
0x1370   :  { %v3537_v4 = vpop.eup %3536  ;;  %v1140_v5 = vrot.slane %v3535_v3, 1 }
0x1371   :  { %v1139_v7 = vrot.slane %v3537_v4, 1 }
0x1372   :  { %v1144_v8 = vsub.f32 %v4055_v28, %v1140_v5 }
0x1373   :  { %v1143_v11 = vsub.f32 %v4057_v31, %v1139_v7 }
0x1374   :  { %v1148_v12 = vrot.slane %v1144_v8, 7 }
0x1375   :  { %v1147_v13 = vrot.slane %v1143_v11, 7 }
0x1376   :  { %1151 = vrot.lane.b32.xlu0 %v1148_v12, %s3767_s14 }
0x1377   :  { %1149 = vrot.lane.b32.xlu1 %v1147_v13, %s3767_s14 }
0x13e8   :  { %v1152_v14 = vpop.permute.xlu0 %1151 }
0x13e9   :  { %v1156_v15 = vmul.f32 %v3533_v56, %v1152_v14  ;;  %v1150_v16 = vpop.permute.xlu1 %1149 }
0x13ea   :  { %v1155_v17 = vmul.f32 %v3531_v55, %v1150_v16 }
0x13eb   :  { %1161 = vrot.lane.b32.xlu0 %v1156_v15, %s3766_s13 }
0x13ec   :  { %1159 = vrot.lane.b32.xlu1 %v1155_v17, %s3766_s13 }
0x145d   :  { %v1162_v19 = vpop.permute.xlu0 %1161 }
0x145e   :  { %v4085_v20 = vadd.f32 %v3535_v3, %v1162_v19  ;;  %v1160_v22 = vpop.permute.xlu1 %1159 }
0x145f   :  { %v4087_v23 = vadd.f32 %v3537_v4, %v1160_v22 }
0x1460   :  { %v1170_v24 = vrot.slane %v4085_v20, 4 }
0x1461   :  { %v1169_v26 = vrot.slane %v4087_v23, 5 }
0x1463   :  { %v1171_v27 = vsel %vm385_vm5, %v1170_v24, %v1169_v26 }
0x1464   :  { %1172 = vrot.lane.b32.xlu1 %v1171_v27, %s3765_s12 }
0x14d6   :  { %v1173_v29 = vpop.permute.xlu1 %1172 }
0x14d7   :  { %3203 = vmatmul.mubr.msk.f32.vlgmr.msra.gmra.mrb[8].mxu0 %vm159_vm4, %v1173_v29 }
0x15aa   :  { %v1242_v32 = vpop.f32.mrb[8].mxu0 }
0x15ab   :  { %v1265_v33 = vadd.f32 %v1242_v32, %v3909_v30  ;;  %v3204_v34 = vpop.f32.mrb[9].mxu0  ;;  %v1247_v41 = vrot.slane %v1242_v32, 2  ;;  %v1248_v42 = vrot.slane %v1242_v32, 3 }
0x15ad   :  { %v1268_v36 = vrot.slane %v1265_v33, 3  ;;  %v1267_v39 = vrot.slane %v1265_v33, 2  ;;  %v1251_v43 = vadd.f32 %v1247_v41, %v3921_v40  ;;  %v1252_v44 = vadd.f32 %v1248_v42, %v3919_v38 }
0x15af   :  { %1271 = vrot.lane.b32.xlu1 %v1268_v36, %s3765_s12  ;;  %1269 = vrot.lane.b32.xlu0 %v1267_v39, %s3765_s12  ;;  %v2968_v21 = vmul.f32 -1.442695, %v1251_v43  ;;  %v2969_v46 = vmul.f32 -1.442695, %v1252_v44 }
0x15b1   :  { %3538 = vpow2.f32 %v2968_v21 }
0x15b2   :  { %3540 = vpow2.f32 %v2969_v46 }
0x15bb   :  { %v3539_v48 = vpop.eup %3538 }
0x15bc   :  { %v3541_v49 = vpop.eup %3540  ;;  %v1259_v50 = vadd.f32 1.0, %v3539_v48 }
0x15bd   :  { %v1260_v25 = vadd.f32 1.0, %v3541_v49 }
0x15be   :  { %3542 = vrcp.f32 %v1259_v50 }
0x15bf   :  { %3544 = vrcp.f32 %v1260_v25 }
0x15c8   :  { %v3543_v51 = vpop.eup %3542 }
0x15c9   :  { %v3545_v52 = vpop.eup %3544 }
0x1621   :  { %v1272_v53 = vpop.permute.xlu1 %1271  ;;  %v1270_v54 = vpop.permute.xlu0 %1269 }
0x1622   :  { %v1276_v55 = vmul.f32 %v3545_v52, %v1272_v53  ;;  %v1275_v56 = vmul.f32 %v3543_v51, %v1270_v54 }
0x1624   :  { %1281 = vrot.lane.b32.xlu1 %v1276_v55, %s3765_s12  ;;  %1279 = vrot.lane.b32.xlu0 %v1275_v56, %s3765_s12 }
0x1696   :  { %v1282_v59 = vpop.permute.xlu1 %1281  ;;  %v1280_v60 = vpop.permute.xlu0 %1279 }
0x1697   :  { %v1286_v61 = vadd.f32 %v1282_v59, %v3919_v38  ;;  %v1285_v62 = vadd.f32 %v1280_v60, %v3921_v40 }
0x1699   :  { %3546 = vtanh.f32 %v1286_v61 }
0x169a   :  { %3548 = vtanh.f32 %v1285_v62 }
0x16a3   :  { %v3547_v63 = vpop.eup %3546 }
0x16a4   :  { %v3549_v0 = vpop.eup %3548  ;;  %v1292_v1 = vrot.slane %v3547_v63, 1 }
0x16a5   :  { %v1291_v2 = vrot.slane %v3549_v0, 1 }
0x16a6   :  { %v1296_v3 = vsub.f32 %v4085_v20, %v1292_v1 }
0x16a7   :  { %v1295_v4 = vsub.f32 %v4087_v23, %v1291_v2 }
0x16a8   :  { %v1300_v5 = vrot.slane %v1296_v3, 7 }
0x16a9   :  { %v1299_v7 = vrot.slane %v1295_v4, 7  ;;  %v1593_v4 = vld [vmem:[#allocation2 + $0x30] sm:$0xff] }
0x16aa   :  { %1303 = vrot.lane.b32.xlu1 %v1300_v5, %s3767_s14 }
0x16ab   :  { %1301 = vrot.lane.b32.xlu0 %v1299_v7, %s3767_s14  ;;  %v1594_v7 = vld [vmem:[#allocation2 + $0x38] sm:$0xff] }
0x171c   :  { %v1304_v8 = vpop.permute.xlu1 %1303 }
0x171d   :  { %v1308_v11 = vmul.f32 %v3545_v52, %v1304_v8  ;;  %v1302_v12 = vpop.permute.xlu0 %1301  ;;  %v2973_v8 = vld [vmem:[%s4512_s3 + $0x20] sm:$0xff] }
0x171e   :  { %v1307_v13 = vmul.f32 %v3543_v51, %v1302_v12 }
0x171f   :  { %1313 = vrot.lane.b32.xlu1 %v1308_v11, %s3766_s13  ;;  %v2974_v11 = vld [vmem:[%s4512_s3 + $0x28] sm:$0xff] }
0x1720   :  { %1311 = vrot.lane.b32.xlu0 %v1307_v13, %s3766_s13  ;;  %v3386_v12 = vpack.c.bf16 %v2974_v11, %v2973_v8  ;;  %v2975_v13 = vld [vmem:[%s4512_s3 + $0x30] sm:$0xff] }
0x1722   :  { %3387 = vmatprep.subr.bf16.mxu0 %v3386_v12 }
0x1723   :  { %3389 = vmatpush3.bf16.msra.mxu0 %v3386_v12 }
0x1791   :  { %v1314_v14 = vpop.permute.xlu1 %1313 }
0x1792   :  { %v4109_v15 = vadd.f32 %v3547_v63, %v1314_v14  ;;  %v1312_v16 = vpop.permute.xlu0 %1311  ;;  %v2976_v14 = vld [vmem:[%s4512_s3 + $0x38] sm:$0xff] }
0x1793   :  { %v4111_v17 = vadd.f32 %v3549_v0, %v1312_v16  ;;  %v4151_v16 = vpack.c.bf16 %v1594_v7, %v1593_v4 }
0x1794   :  { %v1322_v19 = vrot.slane %v4109_v15, 5 }
0x1795   :  { %v1321_v22 = vrot.slane %v4111_v17, 6 }
0x1797   :  { %v1323_v24 = vsel %vm385_vm5, %v1322_v19, %v1321_v22  ;;  %v3390_v19 = vpack.c.bf16 %v2976_v14, %v2975_v13 }
0x1798   :  { %1324 = vrot.lane.b32.xlu0 %v1323_v24, %s3765_s12 }
0x1799   :  { %3391 = vmatprep.subr.bf16.mxu0 %v3390_v19 }
0x179a   :  { %3393 = vmatpush3.bf16.msra.mxu0 %v3390_v19 }
0x179b   :  { %3400 = vmatprep.subr.bf16.mxu0 %v3762_v6 }
0x180a   :  { %v1325_v26 = vpop.permute.xlu0 %1324 }
0x180b   :  { %3214 = vmatmul.mubr.msk.f32.vlgmr.msra.gmra.mrb[8].mxu1 %vm159_vm4, %v1325_v26 }
0x180c   :  { %3235 = vmatprep.mubr.msk.f32.mxu1 %vm3764_vm3, %v3763_v18 }
0x18de   :  { %v1394_v27 = vpop.f32.mrb[8].mxu1 }
0x18df   :  { %v1417_v29 = vadd.f32 %v1394_v27, %v3909_v30  ;;  %v3215_v32 = vpop.f32.mrb[9].mxu1  ;;  %v1399_v36 = vrot.slane %v1394_v27, 1  ;;  %v1400_v39 = vrot.slane %v1394_v27, 2 }
0x18e0   :  { %v1473_v32 = vsel %vm1471_vm6, %v3936_v9, %v3968_v58 }
0x18e1   :  { %v1420_v33 = vrot.slane %v1417_v29, 2  ;;  %v1419_v34 = vrot.slane %v1417_v29, 1  ;;  %v1403_v41 = vadd.f32 %v1399_v36, %v3921_v40  ;;  %v1404_v42 = vadd.f32 %v1400_v39, %v3919_v38  ;;  %v4161_v29 = vld [vmem:[%s4510_s1] sm:$0x3] }
0x18e3   :  { %1423 = vrot.lane.b32.xlu0 %v1420_v33, %s3765_s12  ;;  %1421 = vrot.lane.b32.xlu1 %v1419_v34, %s3765_s12  ;;  %v2971_v43 = vmul.f32 -1.442695, %v1403_v41  ;;  %v2972_v44 = vmul.f32 -1.442695, %v1404_v42  ;;  %v1472_v33 = vsel %vm1471_vm6, %v3938_v10, %v3966_v57  ;;  %v1476_v34 = vsel %vm1474_vm7, %v1473_v32, %v3996_v45 }
0x18e4   :  { %v1475_v36 = vsel %vm1474_vm7, %v1472_v33, %v3998_v47  ;;  %v1479_v39 = vsel %vm1477_vm8, %v1476_v34, %v4026_v35 }
0x18e5   :  { %3550 = vpow2.f32 %v2971_v43  ;;  %v1478_v41 = vsel %vm1477_vm8, %v1475_v36, %v4028_v37  ;;  %v1482_v9 = vsel %vm1480_vm9, %v1479_v39, %v4055_v28 }
0x18e6   :  { %3552 = vpow2.f32 %v2972_v44  ;;  %v1481_v10 = vsel %vm1480_vm9, %v1478_v41, %v4057_v31  ;;  %v1485_v57 = vsel %vm1483_vm10, %v1482_v9, %v4085_v20  ;;  %v2984_v20 = vld [vmem:[#allocation5 + $0x1] ss:$0 sm:$0xff] }
0x18e7   :  { %v1484_v35 = vsel %vm1483_vm10, %v1481_v10, %v4087_v23  ;;  %v1488_v37 = vsel %vm1486_vm11, %v1485_v57, %v4109_v15 }
0x18e8   :  { %v1487_v43 = vsel %vm1486_vm11, %v1484_v35, %v4111_v17 }
0x18ef   :  { %v3551_v21 = vpop.eup %3550 }
0x18f0   :  { %v3553_v46 = vpop.eup %3552  ;;  %v1411_v30 = vadd.f32 1.0, %v3551_v21 }
0x18f1   :  { %v1412_v48 = vadd.f32 1.0, %v3553_v46 }
0x18f2   :  { %3554 = vrcp.f32 %v1411_v30 }
0x18f3   :  { %3556 = vrcp.f32 %v1412_v48  ;;  %v2978_v48 = vld [vmem:[%s4514_s5 + $0x1] ss:$0 sm:$0xff] }
0x18fc   :  { %v3555_v49 = vpop.eup %3554 }
0x18fd   :  { %v3557_v50 = vpop.eup %3556 }
0x1955   :  { %v1424_v25 = vpop.permute.xlu0 %1423  ;;  %v1422_v51 = vpop.permute.xlu1 %1421 }
0x1956   :  { %v1428_v52 = vmul.f32 %v3557_v50, %v1424_v25  ;;  %v1427_v53 = vmul.f32 %v3555_v49, %v1422_v51 }
0x1958   :  { %1433 = vrot.lane.b32.xlu0 %v1428_v52, %s3765_s12  ;;  %1431 = vrot.lane.b32.xlu1 %v1427_v53, %s3765_s12 }
0x19ca   :  { %v1434_v54 = vpop.permute.xlu0 %1433  ;;  %v1432_v55 = vpop.permute.xlu1 %1431 }
0x19cb   :  { %v1438_v56 = vadd.f32 %v1434_v54, %v3919_v38  ;;  %v1437_v59 = vadd.f32 %v1432_v55, %v3921_v40  ;;  %v1591_v38 = vld [vmem:[#allocation2 + $0x20] sm:$0xff]  ;;  %v1592_v40 = vld [vmem:[#allocation2 + $0x28] sm:$0xff] }
0x19cc   :  { %v4136_v5 = vpack.c.bf16 %v1592_v40, %v1591_v38 }
0x19cd   :  { %3558 = vtanh.f32 %v1438_v56 }
0x19ce   :  { %3560 = vtanh.f32 %v1437_v59  ;;  %3396 = vmatpush3.bf16.msra.mxu1 %v4136_v5 }
0x19cf   :  { %3397 = vmatprep.subr.bf16.mxu1 %v3762_v6 }
0x19d2   :  { %3399 = vmatpush3.bf16.msra.mxu1 %v4151_v16 }
0x19d3   :  { %3406 = vmatprep.subr.bf16.mxu1 %v3762_v6 }
0x19d5   :  { %3236 = vmatmul.mubr.msk.f32.vlgmr.msra.gmra.mrb[10].mxu1 %vm159_vm4, %v4161_v29 }
0x19d6   :  { %3408 = vmatpush3.bf16.msra.mxu1 %v4136_v5  ;;  %3257 = vmatprep.mubr.msk.f32.mxu1 %vm3764_vm3, %v3763_v18 }
0x19d7   :  { %v3559_v60 = vpop.eup %3558  ;;  %3409 = vmatprep.subr.bf16.mxu1 %v3762_v6 }
0x19d8   :  { %v4129_v61 = vpop.eup %3560  ;;  %v1444_v62 = vrot.slane %v3559_v60, 1 }
0x19d9   :  { %v1443_v63 = vrot.slane %v4129_v61, 1 }
0x19da   :  { %v1448_v0 = vsub.f32 %v4109_v15, %v1444_v62  ;;  %3411 = vmatpush3.bf16.msra.mxu1 %v4151_v16 }
0x19db   :  { %v1447_v1 = vsub.f32 %v4111_v17, %v1443_v63  ;;  %3418 = vmatprep.subr.bf16.mxu1 %v3762_v6 }
0x19dc   :  { %v1452_v2 = vrot.slane %v1448_v0, 7 }
0x19dd   :  { %v1451_v3 = vrot.slane %v1447_v1, 7 }
0x19de   :  { %1455 = vrot.lane.b32.xlu0 %v1452_v2, %s3767_s14 }
0x19df   :  { %1453 = vrot.lane.b32.xlu1 %v1451_v3, %s3767_s14 }
0x1a50   :  { %v1456_v22 = vpop.permute.xlu0 %1455 }
0x1a51   :  { %v1460_v24 = vmul.f32 %v3557_v50, %v1456_v22  ;;  %v1454_v26 = vpop.permute.xlu1 %1453 }
0x1a52   :  { %v1459_v27 = vmul.f32 %v3555_v49, %v1454_v26 }
0x1a53   :  { %1465 = vrot.lane.b32.xlu0 %v1460_v24, %s3766_s13 }
0x1a54   :  { %1463 = vrot.lane.b32.xlu1 %v1459_v27, %s3766_s13 }
0x1aa8   :  { %v1663_v23 = vpop.f32.mrb[10].mxu1 }
0x1aa9   :  { %v3237_v44 = vpop.f32.mrb[11].mxu1  ;;  %v1668_v50 = vrot.slane %v1663_v23, 1 }
0x1ac5   :  { %v1466_v58 = vpop.permute.xlu0 %1465 }
0x1ac6   :  { %v1470_v45 = vadd.f32 %v3559_v60, %v1466_v58  ;;  %v1464_v47 = vpop.permute.xlu1 %1463 }
0x1ac7   :  { %v1469_v42 = vadd.f32 %v4129_v61, %v1464_v47 }
0x1ac8   :  { %v1491_v28 = vsel %vm1489_vm12, %v1488_v37, %v1470_v45 }
0x1ac9   :  { %1509 = vrot.lane.b32.xlu0 %v1491_v28, %s3765_s12  ;;  %v1490_v31 = vsel %vm1489_vm12, %v1487_v43, %v1469_v42 }
0x1aca   :  { %1507 = vrot.lane.b32.xlu1 %v1490_v31, %s3765_s12 }
0x1ace   :  { %1690 = vrot.lane.b32.xlu1 %v2984_v20, %s3765_s12 }
0x1b3b   :  { %v1510_v21 = vpop.permute.xlu0 %1509 }
0x1b3c   :  { %v1508_v46 = vpop.permute.xlu1 %1507 }
0x1b3d   :  { %3224 = vmatprep.mubr.msk.f32.mxu0 %vm159_vm4, %v1508_v46 }
0x1b3e   :  { %3225 = vmatmul.mubr.msk.f32.vlgmr.msra.gmra.mrb[10].mxu0 %vm159_vm4, %v1510_v21 }
0x1b3f   :  { %3402 = vmatpush3.bf16.msra.mxu0 %v4136_v5  ;;  %3246 = vmatprep.mubr.msk.f32.mxu0 %vm3764_vm3, %v3763_v18 }
0x1b40   :  { %v4209_v15 = vpop.permute.xlu1 %1690  ;;  %3403 = vmatprep.subr.bf16.mxu0 %v3762_v6 }
0x1b41   :  { %v1693_v17 = vadd.f32 %v4209_v15, %v1663_v23 }
0x1b43   :  { %1696 = vrot.lane.b32.xlu1 %v1693_v17, %s3765_s12  ;;  %v1695_v30 = vrot.slane %v1693_v17, 1  ;;  %3405 = vmatpush3.bf16.msra.mxu0 %v4151_v16 }
0x1b44   :  { %3412 = vmatprep.subr.bf16.mxu0 %v3762_v6 }
0x1b45   :  { %1698 = vrot.lane.b32.xlu0 %v1695_v30, %s3765_s12 }
0x1bb5   :  { %v1697_v2 = vpop.permute.xlu1 %1696 }
0x1bb7   :  { %v1699_v63 = vpop.permute.xlu0 %1698 }
0x1c11   :  { %v3226_v49 = vpop.f32.mrb[10].mxu0 }
0x1c12   :  { %v4220_v25 = vadd.f32 %v3226_v49, %v2978_v48  ;;  %v1581_v51 = vpop.f32.mrb[11].mxu0 }
0x1c13   :  { %v4222_v52 = vadd.f32 %v2978_v48, %v1581_v51 }
0x1c14   :  { %v1672_v53 = vadd.f32 %v1668_v50, %v4220_v25 }
0x1c15   :  { %v1671_v54 = vadd.f32 %v1663_v23, %v4222_v52 }
0x1c16   :  { %v2983_v55 = vmul.f32 -1.442695, %v1672_v53 }
0x1c17   :  { %v2982_v56 = vmul.f32 -1.442695, %v1671_v54 }
0x1c18   :  { %3562 = vpow2.f32 %v2983_v55 }
0x1c19   :  { %3564 = vpow2.f32 %v2982_v56 }
0x1c22   :  { %v3563_v59 = vpop.eup %3562 }
0x1c23   :  { %v3565_v60 = vpop.eup %3564  ;;  %v1680_v61 = vadd.f32 1.0, %v3563_v59 }
0x1c24   :  { %v1679_v62 = vadd.f32 1.0, %v3565_v60 }
0x1c25   :  { %3566 = vrcp.f32 %v1680_v61 }
0x1c26   :  { %3568 = vrcp.f32 %v1679_v62 }
0x1c2f   :  { %v3567_v0 = vpop.eup %3566 }
0x1c30   :  { %v3569_v1 = vpop.eup %3568  ;;  %v1703_v3 = vmul.f32 %v3567_v0, %v1699_v63 }
0x1c31   :  { %v1702_v38 = vmul.f32 %v3569_v1, %v1697_v2 }
0x1c32   :  { %1708 = vrot.lane.b32.xlu0 %v1703_v3, %s3765_s12 }
0x1c33   :  { %1706 = vrot.lane.b32.xlu1 %v1702_v38, %s3765_s12 }
0x1ca4   :  { %v1709_v40 = vpop.permute.xlu0 %1708 }
0x1ca5   :  { %v1713_v4 = vadd.f32 %v1709_v40, %v4220_v25  ;;  %v1707_v7 = vpop.permute.xlu1 %1706 }
0x1ca6   :  { %v1712_v8 = vadd.f32 %v1707_v7, %v4222_v52 }
0x1ca7   :  { %3570 = vtanh.f32 %v1713_v4 }
0x1ca8   :  { %3572 = vtanh.f32 %v1712_v8 }
0x1cb1   :  { %v3571_v11 = vpop.eup %3570 }
0x1cb2   :  { %v3573_v12 = vpop.eup %3572  ;;  %v1718_v13 = vrot.slane %v3571_v11, 7 }
0x1cb4   :  { %v1719_v14 = vsel %vm385_vm5, %v1718_v13, %v3573_v12 }
0x1cb5   :  { %1720 = vrot.lane.b32.xlu0 %v1719_v14, %s3765_s12 }
0x1d27   :  { %v1721_v19 = vpop.permute.xlu0 %1720 }
0x1d28   :  { %v1723_v22 = vsub.f32 %v4161_v29, %v1721_v19 }
0x1d2a   :  { %v1725_v24 = vrot.slane %v1723_v22, 1  ;;  %1726 = vrot.lane.b32.xlu0 %v1723_v22, %s3766_s13 }
0x1d2c   :  { %1728 = vrot.lane.b32.xlu1 %v1725_v24, %s3766_s13 }
0x1d9c   :  { %v1727_v26 = vpop.permute.xlu0 %1726 }
0x1d9d   :  { %v1732_v27 = vmul.f32 %v3569_v1, %v1727_v26 }
0x1d9e   :  { %v1729_v32 = vpop.permute.xlu1 %1728 }
0x1d9f   :  { %v1733_v33 = vmul.f32 %v3567_v0, %v1729_v32  ;;  %1736 = vrot.lane.b32.xlu0 %v1732_v27, %s3766_s13 }
0x1da1   :  { %1738 = vrot.lane.b32.xlu1 %v1733_v33, %s3766_s13 }
0x1e11   :  { %v1737_v34 = vpop.permute.xlu0 %1736 }
0x1e12   :  { %v4239_v41 = vadd.f32 %v3573_v12, %v1737_v34 }
0x1e13   :  { %v1739_v36 = vpop.permute.xlu1 %1738 }
0x1e14   :  { %v4237_v39 = vadd.f32 %v3571_v11, %v1739_v36 }
0x1e16   :  { %v1746_v29 = vrot.slane %v4237_v39, 7 }
0x1e18   :  { %v1747_v9 = vsel %vm385_vm5, %v1746_v29, %v4239_v41 }
0x1e19   :  { %1748 = vrot.lane.b32.xlu1 %v1747_v9, %s3765_s12 }
0x1e8b   :  { %v1749_v58 = vpop.permute.xlu1 %1748 }
0x1e8c   :  { %3247 = vmatmul.mubr.msk.f32.vlgmr.msra.gmra.mrb[12].mxu0 %vm159_vm4, %v1749_v58 }
0x1e8d   :  { %3414 = vmatpush3.bf16.msra.mxu0 %v4136_v5  ;;  %3268 = vmatprep.mubr.msk.f32.mxu0 %vm3764_vm3, %v3763_v18 }
0x1e8e   :  { %3415 = vmatprep.subr.bf16.mxu0 %v3762_v6 }
0x1e91   :  { %3417 = vmatpush3.bf16.msra.mxu0 %v4151_v16 }
0x1e92   :  { %3424 = vmatprep.subr.bf16.mxu0 %v3762_v6 }
0x1f5f   :  { %v1818_v10 = vpop.f32.mrb[12].mxu0 }
0x1f60   :  { %v1840_v57 = vadd.f32 %v1818_v10, %v4209_v15  ;;  %v3248_v45 = vpop.f32.mrb[13].mxu0  ;;  %v1823_v35 = vrot.slane %v1818_v10, 7  ;;  %v1827_v42 = vadd.f32 %v1818_v10, %v4220_v25 }
0x1f62   :  { %1845 = vrot.lane.b32.xlu1 %v1840_v57, %s3765_s12  ;;  %v1842_v47 = vrot.slane %v1840_v57, 7  ;;  %v1826_v37 = vadd.f32 %v1823_v35, %v4222_v52  ;;  %v2987_v28 = vmul.f32 -1.442695, %v1827_v42 }
0x1f64   :  { %1843 = vrot.lane.b32.xlu0 %v1842_v47, %s3765_s12  ;;  %v2986_v43 = vmul.f32 -1.442695, %v1826_v37  ;;  %3574 = vpow2.f32 %v2987_v28 }
0x1f66   :  { %3576 = vpow2.f32 %v2986_v43 }
0x1f6e   :  { %v3575_v31 = vpop.eup %3574 }
0x1f6f   :  { %v1835_v23 = vadd.f32 1.0, %v3575_v31 }
0x1f70   :  { %v3577_v20 = vpop.eup %3576 }
0x1f71   :  { %v1834_v44 = vadd.f32 1.0, %v3577_v20  ;;  %3578 = vrcp.f32 %v1835_v23 }
0x1f73   :  { %3580 = vrcp.f32 %v1834_v44 }
0x1f7b   :  { %v3579_v21 = vpop.eup %3578 }
0x1f7d   :  { %v3581_v30 = vpop.eup %3580 }
0x1fd4   :  { %v1846_v46 = vpop.permute.xlu1 %1845 }
0x1fd5   :  { %v1850_v17 = vmul.f32 %v3579_v21, %v1846_v46 }
0x1fd6   :  { %v1844_v48 = vpop.permute.xlu0 %1843 }
0x1fd7   :  { %v1849_v49 = vmul.f32 %v3581_v30, %v1844_v48  ;;  %1855 = vrot.lane.b32.xlu1 %v1850_v17, %s3765_s12 }
0x1fd9   :  { %1853 = vrot.lane.b32.xlu0 %v1849_v49, %s3765_s12 }
0x2049   :  { %v1856_v50 = vpop.permute.xlu1 %1855 }
0x204a   :  { %v1860_v51 = vadd.f32 %v1856_v50, %v4220_v25 }
0x204b   :  { %v1854_v53 = vpop.permute.xlu0 %1853 }
0x204c   :  { %3582 = vtanh.f32 %v1860_v51  ;;  %v1859_v54 = vadd.f32 %v1854_v53, %v4222_v52 }
0x204e   :  { %3584 = vtanh.f32 %v1859_v54 }
0x2056   :  { %v3583_v55 = vpop.eup %3582 }
0x2057   :  { %v1866_v56 = vrot.slane %v3583_v55, 1 }
0x2058   :  { %v3585_v59 = vpop.eup %3584 }
0x2059   :  { %v1870_v60 = vsub.f32 %v4237_v39, %v1866_v56  ;;  %v1865_v61 = vrot.slane %v3585_v59, 1 }
0x205b   :  { %v1874_v62 = vrot.slane %v1870_v60, 7  ;;  %v1869_v63 = vsub.f32 %v4239_v41, %v1865_v61 }
0x205d   :  { %1877 = vrot.lane.b32.xlu1 %v1874_v62, %s3767_s14  ;;  %v1873_v0 = vrot.slane %v1869_v63, 7 }
0x205f   :  { %1875 = vrot.lane.b32.xlu0 %v1873_v0, %s3767_s14 }
0x20cf   :  { %v1878_v1 = vpop.permute.xlu1 %1877 }
0x20d0   :  { %v1882_v2 = vmul.f32 %v3579_v21, %v1878_v1 }
0x20d1   :  { %v1876_v3 = vpop.permute.xlu0 %1875 }
0x20d2   :  { %v1881_v38 = vmul.f32 %v3581_v30, %v1876_v3  ;;  %1887 = vrot.lane.b32.xlu1 %v1882_v2, %s3766_s13 }
0x20d4   :  { %1885 = vrot.lane.b32.xlu0 %v1881_v38, %s3766_s13 }
0x2144   :  { %v1888_v40 = vpop.permute.xlu1 %1887 }
0x2145   :  { %v4269_v8 = vadd.f32 %v3583_v55, %v1888_v40 }
0x2146   :  { %v1886_v4 = vpop.permute.xlu0 %1885 }
0x2147   :  { %v4267_v7 = vadd.f32 %v3585_v59, %v1886_v4 }
0x2149   :  { %v1895_v11 = vrot.slane %v4267_v7, 1 }
0x214b   :  { %v1896_v12 = vsel %vm385_vm5, %v4269_v8, %v1895_v11 }
0x214c   :  { %1897 = vrot.lane.b32.xlu0 %v1896_v12, %s3765_s12 }
0x21be   :  { %v1898_v13 = vpop.permute.xlu0 %1897 }
0x21bf   :  { %3258 = vmatmul.mubr.msk.f32.vlgmr.msra.gmra.mrb[12].mxu1 %vm159_vm4, %v1898_v13 }
0x21c0   :  { %3420 = vmatpush3.bf16.msra.mxu1 %v4136_v5  ;;  %3279 = vmatprep.mubr.msk.f32.mxu1 %vm3764_vm3, %v3763_v18 }
0x21c1   :  { %3421 = vmatprep.subr.bf16.mxu1 %v3762_v6 }
0x21c4   :  { %3423 = vmatpush3.bf16.msra.mxu1 %v4151_v16 }
0x21c5   :  { %3430 = vmatprep.subr.bf16.mxu1 %v3762_v6 }
0x2292   :  { %v1967_v14 = vpop.f32.mrb[12].mxu1 }
0x2293   :  { %v1990_v19 = vadd.f32 %v1967_v14, %v4209_v15  ;;  %v3259_v22 = vpop.f32.mrb[13].mxu1  ;;  %v1972_v27 = vrot.slane %v1967_v14, 6  ;;  %v1973_v32 = vrot.slane %v1967_v14, 7 }
0x2295   :  { %v1993_v24 = vrot.slane %v1990_v19, 7  ;;  %v1992_v26 = vrot.slane %v1990_v19, 6  ;;  %v1976_v33 = vadd.f32 %v1972_v27, %v4222_v52  ;;  %v1977_v34 = vadd.f32 %v1973_v32, %v4220_v25 }
0x2297   :  { %1996 = vrot.lane.b32.xlu0 %v1993_v24, %s3765_s12  ;;  %1994 = vrot.lane.b32.xlu1 %v1992_v26, %s3765_s12  ;;  %v2989_v36 = vmul.f32 -1.442695, %v1976_v33  ;;  %v2990_v29 = vmul.f32 -1.442695, %v1977_v34 }
0x2299   :  { %3586 = vpow2.f32 %v2989_v36 }
0x229a   :  { %3588 = vpow2.f32 %v2990_v29 }
0x22a3   :  { %v3587_v9 = vpop.eup %3586 }
0x22a4   :  { %v3589_v58 = vpop.eup %3588  ;;  %v1984_v10 = vadd.f32 1.0, %v3587_v9 }
0x22a5   :  { %v1985_v57 = vadd.f32 1.0, %v3589_v58 }
0x22a6   :  { %3590 = vrcp.f32 %v1984_v10 }
0x22a7   :  { %3592 = vrcp.f32 %v1985_v57 }
0x22b0   :  { %v3591_v45 = vpop.eup %3590 }
0x22b1   :  { %v3593_v47 = vpop.eup %3592 }
0x2309   :  { %v1997_v35 = vpop.permute.xlu0 %1996  ;;  %v1995_v42 = vpop.permute.xlu1 %1994 }
0x230a   :  { %v2001_v37 = vmul.f32 %v3593_v47, %v1997_v35  ;;  %v2000_v28 = vmul.f32 %v3591_v45, %v1995_v42 }
0x230c   :  { %2006 = vrot.lane.b32.xlu0 %v2001_v37, %s3765_s12  ;;  %2004 = vrot.lane.b32.xlu1 %v2000_v28, %s3765_s12 }
0x237e   :  { %v2007_v43 = vpop.permute.xlu0 %2006  ;;  %v2005_v31 = vpop.permute.xlu1 %2004 }
0x237f   :  { %v2011_v20 = vadd.f32 %v2007_v43, %v4220_v25  ;;  %v2010_v23 = vadd.f32 %v2005_v31, %v4222_v52 }
0x2381   :  { %3594 = vtanh.f32 %v2011_v20 }
0x2382   :  { %3596 = vtanh.f32 %v2010_v23 }
0x238b   :  { %v3595_v44 = vpop.eup %3594 }
0x238c   :  { %v3597_v21 = vpop.eup %3596  ;;  %v2017_v46 = vrot.slane %v3595_v44, 1 }
0x238d   :  { %v2016_v17 = vrot.slane %v3597_v21, 1 }
0x238e   :  { %v2021_v30 = vsub.f32 %v4269_v8, %v2017_v46 }
0x238f   :  { %v2020_v48 = vsub.f32 %v4267_v7, %v2016_v17 }
0x2390   :  { %v2025_v49 = vrot.slane %v2021_v30, 7 }
0x2391   :  { %v2024_v50 = vrot.slane %v2020_v48, 7 }
0x2392   :  { %2028 = vrot.lane.b32.xlu0 %v2025_v49, %s3767_s14 }
0x2393   :  { %2026 = vrot.lane.b32.xlu1 %v2024_v50, %s3767_s14 }
0x2404   :  { %v2029_v51 = vpop.permute.xlu0 %2028 }
0x2405   :  { %v2033_v53 = vmul.f32 %v3593_v47, %v2029_v51  ;;  %v2027_v54 = vpop.permute.xlu1 %2026 }
0x2406   :  { %v2032_v55 = vmul.f32 %v3591_v45, %v2027_v54 }
0x2407   :  { %2038 = vrot.lane.b32.xlu0 %v2033_v53, %s3766_s13 }
0x2408   :  { %2036 = vrot.lane.b32.xlu1 %v2032_v55, %s3766_s13 }
0x2479   :  { %v2039_v56 = vpop.permute.xlu0 %2038 }
0x247a   :  { %v4297_v59 = vadd.f32 %v3595_v44, %v2039_v56  ;;  %v2037_v60 = vpop.permute.xlu1 %2036 }
0x247b   :  { %v4299_v61 = vadd.f32 %v3597_v21, %v2037_v60 }
0x247c   :  { %v2047_v62 = vrot.slane %v4297_v59, 1 }
0x247d   :  { %v2046_v63 = vrot.slane %v4299_v61, 2 }
0x247f   :  { %v2048_v0 = vsel %vm385_vm5, %v2047_v62, %v2046_v63 }
0x2480   :  { %2049 = vrot.lane.b32.xlu1 %v2048_v0, %s3765_s12 }
0x24f2   :  { %v2050_v1 = vpop.permute.xlu1 %2049 }
0x24f3   :  { %3269 = vmatmul.mubr.msk.f32.vlgmr.msra.gmra.mrb[14].mxu0 %vm159_vm4, %v2050_v1 }
0x24f4   :  { %3426 = vmatpush3.bf16.msra.mxu0 %v4136_v5  ;;  %3290 = vmatprep.mubr.msk.f32.mxu0 %vm3764_vm3, %v3763_v18 }
0x24f5   :  { %3427 = vmatprep.subr.bf16.mxu0 %v3762_v6 }
0x24f8   :  { %3429 = vmatpush3.bf16.msra.mxu0 %v4151_v16 }
0x24f9   :  { %3436 = vmatprep.subr.bf16.mxu0 %v3762_v6 }
0x25c6   :  { %v2119_v2 = vpop.f32.mrb[14].mxu0 }
0x25c7   :  { %v2142_v3 = vadd.f32 %v2119_v2, %v4209_v15  ;;  %v3270_v38 = vpop.f32.mrb[15].mxu0  ;;  %v2124_v11 = vrot.slane %v2119_v2, 5  ;;  %v2125_v12 = vrot.slane %v2119_v2, 6 }
0x25c9   :  { %v2144_v40 = vrot.slane %v2142_v3, 5  ;;  %v2145_v4 = vrot.slane %v2142_v3, 6  ;;  %v2128_v13 = vadd.f32 %v2124_v11, %v4222_v52  ;;  %v2129_v14 = vadd.f32 %v2125_v12, %v4220_v25 }
0x25cb   :  { %2148 = vrot.lane.b32.xlu1 %v2145_v4, %s3765_s12  ;;  %2146 = vrot.lane.b32.xlu0 %v2144_v40, %s3765_s12  ;;  %v2992_v19 = vmul.f32 -1.442695, %v2128_v13  ;;  %v2993_v22 = vmul.f32 -1.442695, %v2129_v14 }
0x25cd   :  { %3598 = vpow2.f32 %v2992_v19 }
0x25ce   :  { %3600 = vpow2.f32 %v2993_v22 }
0x25d7   :  { %v3599_v24 = vpop.eup %3598 }
0x25d8   :  { %v3601_v26 = vpop.eup %3600  ;;  %v2136_v27 = vadd.f32 1.0, %v3599_v24 }
0x25d9   :  { %v2137_v32 = vadd.f32 1.0, %v3601_v26 }
0x25da   :  { %3602 = vrcp.f32 %v2136_v27 }
0x25db   :  { %3604 = vrcp.f32 %v2137_v32 }
0x25e4   :  { %v3603_v33 = vpop.eup %3602 }
0x25e5   :  { %v3605_v34 = vpop.eup %3604 }
0x263d   :  { %v2149_v36 = vpop.permute.xlu1 %2148  ;;  %v2147_v29 = vpop.permute.xlu0 %2146 }
0x263e   :  { %v2153_v9 = vmul.f32 %v3605_v34, %v2149_v36  ;;  %v2152_v58 = vmul.f32 %v3603_v33, %v2147_v29 }
0x2640   :  { %2158 = vrot.lane.b32.xlu1 %v2153_v9, %s3765_s12  ;;  %2156 = vrot.lane.b32.xlu0 %v2152_v58, %s3765_s12 }
0x26b2   :  { %v2159_v10 = vpop.permute.xlu1 %2158  ;;  %v2157_v57 = vpop.permute.xlu0 %2156 }
0x26b3   :  { %v2163_v45 = vadd.f32 %v2159_v10, %v4220_v25  ;;  %v2162_v47 = vadd.f32 %v2157_v57, %v4222_v52 }
0x26b5   :  { %3606 = vtanh.f32 %v2163_v45 }
0x26b6   :  { %3608 = vtanh.f32 %v2162_v47 }
0x26bf   :  { %v3607_v35 = vpop.eup %3606 }
0x26c0   :  { %v3609_v42 = vpop.eup %3608  ;;  %v2169_v37 = vrot.slane %v3607_v35, 1 }
0x26c1   :  { %v2168_v28 = vrot.slane %v3609_v42, 1 }
0x26c2   :  { %v2173_v43 = vsub.f32 %v4297_v59, %v2169_v37 }
0x26c3   :  { %v2172_v31 = vsub.f32 %v4299_v61, %v2168_v28 }
0x26c4   :  { %v2177_v20 = vrot.slane %v2173_v43, 7 }
0x26c5   :  { %v2176_v23 = vrot.slane %v2172_v31, 7 }
0x26c6   :  { %2180 = vrot.lane.b32.xlu1 %v2177_v20, %s3767_s14 }
0x26c7   :  { %2178 = vrot.lane.b32.xlu0 %v2176_v23, %s3767_s14 }
0x2738   :  { %v2181_v44 = vpop.permute.xlu1 %2180 }
0x2739   :  { %v2185_v21 = vmul.f32 %v3605_v34, %v2181_v44  ;;  %v2179_v46 = vpop.permute.xlu0 %2178 }
0x273a   :  { %v2184_v17 = vmul.f32 %v3603_v33, %v2179_v46 }
0x273b   :  { %2190 = vrot.lane.b32.xlu1 %v2185_v21, %s3766_s13 }
0x273c   :  { %2188 = vrot.lane.b32.xlu0 %v2184_v17, %s3766_s13 }
0x27ad   :  { %v2191_v30 = vpop.permute.xlu1 %2190 }
0x27ae   :  { %v4327_v48 = vadd.f32 %v3607_v35, %v2191_v30  ;;  %v2189_v49 = vpop.permute.xlu0 %2188 }
0x27af   :  { %v4329_v50 = vadd.f32 %v3609_v42, %v2189_v49 }
0x27b0   :  { %v2199_v51 = vrot.slane %v4327_v48, 2 }
0x27b1   :  { %v2198_v53 = vrot.slane %v4329_v50, 3 }
0x27b3   :  { %v2200_v54 = vsel %vm385_vm5, %v2199_v51, %v2198_v53 }
0x27b4   :  { %2201 = vrot.lane.b32.xlu0 %v2200_v54, %s3765_s12 }
0x2826   :  { %v2202_v55 = vpop.permute.xlu0 %2201 }
0x2827   :  { %3280 = vmatmul.mubr.msk.f32.vlgmr.msra.gmra.mrb[14].mxu1 %vm159_vm4, %v2202_v55 }
0x2828   :  { %3432 = vmatpush3.bf16.msra.mxu1 %v4136_v5  ;;  %3301 = vmatprep.mubr.msk.f32.mxu1 %vm3764_vm3, %v3763_v18 }
0x2829   :  { %3433 = vmatprep.subr.bf16.mxu1 %v3762_v6 }
0x282c   :  { %3435 = vmatpush3.bf16.msra.mxu1 %v4151_v16 }
0x28fa   :  { %v2271_v56 = vpop.f32.mrb[14].mxu1 }
0x28fb   :  { %v2294_v60 = vadd.f32 %v2271_v56, %v4209_v15  ;;  %v3281_v62 = vpop.f32.mrb[15].mxu1  ;;  %v2276_v1 = vrot.slane %v2271_v56, 4  ;;  %v2277_v2 = vrot.slane %v2271_v56, 5 }
0x28fd   :  { %v2296_v63 = vrot.slane %v2294_v60, 4  ;;  %v2297_v0 = vrot.slane %v2294_v60, 5  ;;  %v2280_v3 = vadd.f32 %v2276_v1, %v4222_v52  ;;  %v2281_v38 = vadd.f32 %v2277_v2, %v4220_v25 }
0x28ff   :  { %2300 = vrot.lane.b32.xlu0 %v2297_v0, %s3765_s12  ;;  %2298 = vrot.lane.b32.xlu1 %v2296_v63, %s3765_s12  ;;  %v2995_v40 = vmul.f32 -1.442695, %v2280_v3  ;;  %v2996_v4 = vmul.f32 -1.442695, %v2281_v38 }
0x2901   :  { %3610 = vpow2.f32 %v2995_v40 }
0x2902   :  { %3612 = vpow2.f32 %v2996_v4 }
0x290b   :  { %v3611_v11 = vpop.eup %3610 }
0x290c   :  { %v3613_v12 = vpop.eup %3612  ;;  %v2288_v13 = vadd.f32 1.0, %v3611_v11 }
0x290d   :  { %v2289_v14 = vadd.f32 1.0, %v3613_v12 }
0x290e   :  { %3614 = vrcp.f32 %v2288_v13 }
0x290f   :  { %3616 = vrcp.f32 %v2289_v14 }
0x2918   :  { %v3615_v19 = vpop.eup %3614 }
0x2919   :  { %v3617_v22 = vpop.eup %3616 }
0x2971   :  { %v2301_v24 = vpop.permute.xlu0 %2300  ;;  %v2299_v26 = vpop.permute.xlu1 %2298 }
0x2972   :  { %v2305_v27 = vmul.f32 %v3617_v22, %v2301_v24  ;;  %v2304_v32 = vmul.f32 %v3615_v19, %v2299_v26 }
0x2974   :  { %2310 = vrot.lane.b32.xlu0 %v2305_v27, %s3765_s12  ;;  %2308 = vrot.lane.b32.xlu1 %v2304_v32, %s3765_s12 }
0x29e6   :  { %v2311_v33 = vpop.permute.xlu0 %2310  ;;  %v2309_v34 = vpop.permute.xlu1 %2308 }
0x29e7   :  { %v2315_v36 = vadd.f32 %v2311_v33, %v4220_v25  ;;  %v2314_v29 = vadd.f32 %v2309_v34, %v4222_v52 }
0x29e9   :  { %3618 = vtanh.f32 %v2315_v36 }
0x29ea   :  { %3620 = vtanh.f32 %v2314_v29 }
0x29f3   :  { %v3619_v9 = vpop.eup %3618 }
0x29f4   :  { %v3621_v58 = vpop.eup %3620  ;;  %v2321_v10 = vrot.slane %v3619_v9, 1 }
0x29f5   :  { %v2320_v57 = vrot.slane %v3621_v58, 1 }
0x29f6   :  { %v2325_v45 = vsub.f32 %v4327_v48, %v2321_v10 }
0x29f7   :  { %v2324_v47 = vsub.f32 %v4329_v50, %v2320_v57 }
0x29f8   :  { %v2329_v35 = vrot.slane %v2325_v45, 7 }
0x29f9   :  { %v2328_v42 = vrot.slane %v2324_v47, 7 }
0x29fa   :  { %2332 = vrot.lane.b32.xlu0 %v2329_v35, %s3767_s14 }
0x29fb   :  { %2330 = vrot.lane.b32.xlu1 %v2328_v42, %s3767_s14 }
0x2a6c   :  { %v2333_v37 = vpop.permute.xlu0 %2332 }
0x2a6d   :  { %v2337_v28 = vmul.f32 %v3617_v22, %v2333_v37  ;;  %v2331_v43 = vpop.permute.xlu1 %2330 }
0x2a6e   :  { %v2336_v31 = vmul.f32 %v3615_v19, %v2331_v43 }
0x2a6f   :  { %2342 = vrot.lane.b32.xlu0 %v2337_v28, %s3766_s13 }
0x2a70   :  { %2340 = vrot.lane.b32.xlu1 %v2336_v31, %s3766_s13 }
0x2ae1   :  { %v2343_v20 = vpop.permute.xlu0 %2342 }
0x2ae2   :  { %v4356_v23 = vadd.f32 %v3619_v9, %v2343_v20  ;;  %v2341_v44 = vpop.permute.xlu1 %2340 }
0x2ae3   :  { %v4358_v21 = vadd.f32 %v3621_v58, %v2341_v44 }
0x2ae4   :  { %v2351_v46 = vrot.slane %v4356_v23, 3 }
0x2ae5   :  { %v2350_v17 = vrot.slane %v4358_v21, 4 }
0x2ae7   :  { %v2352_v30 = vsel %vm385_vm5, %v2351_v46, %v2350_v17 }
0x2ae8   :  { %2353 = vrot.lane.b32.xlu1 %v2352_v30, %s3765_s12 }
0x2b5a   :  { %v2354_v49 = vpop.permute.xlu1 %2353 }
0x2b5b   :  { %3291 = vmatmul.mubr.msk.f32.vlgmr.msra.gmra.mrb[16].mxu0 %vm159_vm4, %v2354_v49 }
0x2b5c   :  { %3438 = vmatpush3.bf16.msra.mxu0 %v4136_v5  ;;  %3312 = vmatprep.mubr.msk.f32.mxu0 %vm3764_vm3, %v3763_v18 }
0x2b5d   :  { %3439 = vmatprep.subr.bf16.mxu0 %v3762_v6 }
0x2b60   :  { %3441 = vmatpush3.bf16.msra.mxu0 %v4151_v16 }
0x2c2e   :  { %v2423_v51 = vpop.f32.mrb[16].mxu0 }
0x2c2f   :  { %v2446_v53 = vadd.f32 %v2423_v51, %v4209_v15  ;;  %v3292_v54 = vpop.f32.mrb[17].mxu0  ;;  %v2428_v60 = vrot.slane %v2423_v51, 3  ;;  %v2429_v62 = vrot.slane %v2423_v51, 4 }
0x2c31   :  { %v2448_v55 = vrot.slane %v2446_v53, 3  ;;  %v2449_v56 = vrot.slane %v2446_v53, 4  ;;  %v2432_v5 = vadd.f32 %v2428_v60, %v4222_v52  ;;  %v2433_v18 = vadd.f32 %v2429_v62, %v4220_v25 }
0x2c33   :  { %2452 = vrot.lane.b32.xlu1 %v2449_v56, %s3765_s12  ;;  %2450 = vrot.lane.b32.xlu0 %v2448_v55, %s3765_s12  ;;  %v2998_v63 = vmul.f32 -1.442695, %v2432_v5  ;;  %v2999_v6 = vmul.f32 -1.442695, %v2433_v18 }
0x2c35   :  { %3622 = vpow2.f32 %v2998_v63 }
0x2c36   :  { %3624 = vpow2.f32 %v2999_v6 }
0x2c3f   :  { %v3623_v16 = vpop.eup %3622 }
0x2c40   :  { %v3625_v0 = vpop.eup %3624  ;;  %v2440_v1 = vadd.f32 1.0, %v3623_v16 }
0x2c41   :  { %v2441_v2 = vadd.f32 1.0, %v3625_v0 }
0x2c42   :  { %3626 = vrcp.f32 %v2440_v1 }
0x2c43   :  { %3628 = vrcp.f32 %v2441_v2 }
0x2c4c   :  { %v3627_v3 = vpop.eup %3626 }
0x2c4d   :  { %v3629_v38 = vpop.eup %3628 }
0x2ca5   :  { %v2453_v40 = vpop.permute.xlu1 %2452  ;;  %v2451_v4 = vpop.permute.xlu0 %2450 }
0x2ca6   :  { %v2457_v11 = vmul.f32 %v3629_v38, %v2453_v40  ;;  %v2456_v12 = vmul.f32 %v3627_v3, %v2451_v4 }
0x2ca8   :  { %2462 = vrot.lane.b32.xlu1 %v2457_v11, %s3765_s12  ;;  %2460 = vrot.lane.b32.xlu0 %v2456_v12, %s3765_s12 }
0x2d1a   :  { %v2463_v13 = vpop.permute.xlu1 %2462  ;;  %v2461_v14 = vpop.permute.xlu0 %2460 }
0x2d1b   :  { %v2467_v19 = vadd.f32 %v2463_v13, %v4220_v25  ;;  %v2466_v22 = vadd.f32 %v2461_v14, %v4222_v52 }
0x2d1d   :  { %3630 = vtanh.f32 %v2467_v19 }
0x2d1e   :  { %3632 = vtanh.f32 %v2466_v22 }
0x2d27   :  { %v3631_v24 = vpop.eup %3630 }
0x2d28   :  { %v3633_v26 = vpop.eup %3632  ;;  %v2473_v27 = vrot.slane %v3631_v24, 1 }
0x2d29   :  { %v2472_v32 = vrot.slane %v3633_v26, 1 }
0x2d2a   :  { %v2477_v33 = vsub.f32 %v4356_v23, %v2473_v27 }
0x2d2b   :  { %v2476_v34 = vsub.f32 %v4358_v21, %v2472_v32 }
0x2d2c   :  { %v2481_v36 = vrot.slane %v2477_v33, 7 }
0x2d2d   :  { %v2480_v29 = vrot.slane %v2476_v34, 7 }
0x2d2e   :  { %2484 = vrot.lane.b32.xlu1 %v2481_v36, %s3767_s14 }
0x2d2f   :  { %2482 = vrot.lane.b32.xlu0 %v2480_v29, %s3767_s14 }
0x2da0   :  { %v2485_v9 = vpop.permute.xlu1 %2484 }
0x2da1   :  { %v2489_v58 = vmul.f32 %v3629_v38, %v2485_v9  ;;  %v2483_v10 = vpop.permute.xlu0 %2482 }
0x2da2   :  { %v2488_v57 = vmul.f32 %v3627_v3, %v2483_v10 }
0x2da3   :  { %2494 = vrot.lane.b32.xlu1 %v2489_v58, %s3766_s13 }
0x2da4   :  { %2492 = vrot.lane.b32.xlu0 %v2488_v57, %s3766_s13 }
0x2e15   :  { %v2495_v45 = vpop.permute.xlu1 %2494 }
0x2e16   :  { %v4385_v47 = vadd.f32 %v3631_v24, %v2495_v45  ;;  %v2493_v35 = vpop.permute.xlu0 %2492 }
0x2e17   :  { %v4387_v42 = vadd.f32 %v3633_v26, %v2493_v35 }
0x2e18   :  { %v2503_v37 = vrot.slane %v4385_v47, 4 }
0x2e19   :  { %v2502_v28 = vrot.slane %v4387_v42, 5 }
0x2e1b   :  { %v2504_v43 = vsel %vm385_vm5, %v2503_v37, %v2502_v28 }
0x2e1c   :  { %2505 = vrot.lane.b32.xlu0 %v2504_v43, %s3765_s12 }
0x2e8e   :  { %v2506_v31 = vpop.permute.xlu0 %2505 }
0x2e8f   :  { %3302 = vmatmul.mubr.msk.f32.vlgmr.msra.gmra.mrb[16].mxu1 %vm159_vm4, %v2506_v31 }
0x2f62   :  { %v2575_v20 = vpop.f32.mrb[16].mxu1 }
0x2f63   :  { %v2598_v44 = vadd.f32 %v2575_v20, %v4209_v15  ;;  %v3303_v46 = vpop.f32.mrb[17].mxu1  ;;  %v2580_v49 = vrot.slane %v2575_v20, 2  ;;  %v2581_v51 = vrot.slane %v2575_v20, 3 }
0x2f65   :  { %v2600_v17 = vrot.slane %v2598_v44, 2  ;;  %v2601_v30 = vrot.slane %v2598_v44, 3  ;;  %v2584_v53 = vadd.f32 %v2580_v49, %v4222_v52  ;;  %v2585_v54 = vadd.f32 %v2581_v51, %v4220_v25 }
0x2f67   :  { %2604 = vrot.lane.b32.xlu0 %v2601_v30, %s3765_s12  ;;  %2602 = vrot.lane.b32.xlu1 %v2600_v17, %s3765_s12  ;;  %v3001_v55 = vmul.f32 -1.442695, %v2584_v53  ;;  %v3002_v56 = vmul.f32 -1.442695, %v2585_v54 }
0x2f69   :  { %3634 = vpow2.f32 %v3001_v55 }
0x2f6a   :  { %3636 = vpow2.f32 %v3002_v56 }
0x2f73   :  { %v3635_v60 = vpop.eup %3634 }
0x2f74   :  { %v3637_v62 = vpop.eup %3636  ;;  %v2592_v5 = vadd.f32 1.0, %v3635_v60 }
0x2f75   :  { %v2593_v18 = vadd.f32 1.0, %v3637_v62 }
0x2f76   :  { %3638 = vrcp.f32 %v2592_v5 }
0x2f77   :  { %3640 = vrcp.f32 %v2593_v18 }
0x2f80   :  { %v3639_v63 = vpop.eup %3638 }
0x2f81   :  { %v3641_v6 = vpop.eup %3640 }
0x2fd9   :  { %v2605_v16 = vpop.permute.xlu0 %2604  ;;  %v2603_v0 = vpop.permute.xlu1 %2602 }
0x2fda   :  { %v2609_v1 = vmul.f32 %v3641_v6, %v2605_v16  ;;  %v2608_v2 = vmul.f32 %v3639_v63, %v2603_v0 }
0x2fdc   :  { %2614 = vrot.lane.b32.xlu0 %v2609_v1, %s3765_s12  ;;  %2612 = vrot.lane.b32.xlu1 %v2608_v2, %s3765_s12 }
0x304e   :  { %v2615_v3 = vpop.permute.xlu0 %2614  ;;  %v2613_v38 = vpop.permute.xlu1 %2612 }
0x304f   :  { %v2619_v40 = vadd.f32 %v2615_v3, %v4220_v25  ;;  %v2618_v4 = vadd.f32 %v2613_v38, %v4222_v52 }
0x3051   :  { %3642 = vtanh.f32 %v2619_v40 }
0x3052   :  { %3644 = vtanh.f32 %v2618_v4 }
0x305b   :  { %v3643_v11 = vpop.eup %3642 }
0x305c   :  { %v3645_v12 = vpop.eup %3644  ;;  %v2625_v13 = vrot.slane %v3643_v11, 1 }
0x305d   :  { %v2624_v14 = vrot.slane %v3645_v12, 1 }
0x305e   :  { %v2629_v19 = vsub.f32 %v4385_v47, %v2625_v13 }
0x305f   :  { %v2628_v22 = vsub.f32 %v4387_v42, %v2624_v14  ;;  %v2820_v14 = vld [vmem:[%s4516_s7 + $0x10] sm:$0xff] }
0x3060   :  { %v2633_v24 = vrot.slane %v2629_v19, 7 }
0x3061   :  { %v2632_v26 = vrot.slane %v2628_v22, 7  ;;  %v2821_v22 = vld [vmem:[%s4516_s7 + $0x18] sm:$0xff] }
0x3062   :  { %2636 = vrot.lane.b32.xlu0 %v2633_v24, %s3767_s14  ;;  %v3446_v24 = vpack.c.bf16 %v2821_v22, %v2820_v14 }
0x3063   :  { %2634 = vrot.lane.b32.xlu1 %v2632_v26, %s3767_s14 }
0x30d4   :  { %v2637_v27 = vpop.permute.xlu0 %2636 }
0x30d5   :  { %v2641_v32 = vmul.f32 %v3641_v6, %v2637_v27  ;;  %v2635_v33 = vpop.permute.xlu1 %2634 }
0x30d6   :  { %v2640_v34 = vmul.f32 %v3639_v63, %v2635_v33 }
0x30d7   :  { %2646 = vrot.lane.b32.xlu0 %v2641_v32, %s3766_s13 }
0x30d8   :  { %2644 = vrot.lane.b32.xlu1 %v2640_v34, %s3766_s13  ;;  %v2805_v34 = vsel %vm1471_vm6, %v4237_v39, %v4269_v8 }
0x3149   :  { %v2647_v36 = vpop.permute.xlu0 %2646 }
0x314a   :  { %v4409_v29 = vadd.f32 %v3643_v11, %v2647_v36  ;;  %v2645_v9 = vpop.permute.xlu1 %2644  ;;  %v2804_v36 = vsel %vm1471_vm6, %v4239_v41, %v4267_v7 }
0x314b   :  { %v4411_v58 = vadd.f32 %v3645_v12, %v2645_v9  ;;  %v2807_v9 = vsel %vm1474_vm7, %v2805_v34, %v4297_v59 }
0x314c   :  { %v2655_v10 = vrot.slane %v4409_v29, 5 }
0x314d   :  { %v2654_v57 = vrot.slane %v4411_v58, 6 }
0x314f   :  { %v2656_v45 = vsel %vm385_vm5, %v2655_v10, %v2654_v57  ;;  %v2806_v10 = vsel %vm1474_vm7, %v2804_v36, %v4299_v61  ;;  %v2809_v57 = vsel %vm1477_vm8, %v2807_v9, %v4327_v48 }
0x3150   :  { %2657 = vrot.lane.b32.xlu1 %v2656_v45, %s3765_s12  ;;  %v2808_v45 = vsel %vm1477_vm8, %v2806_v10, %v4329_v50 }
0x3151   :  { %v2810_v8 = vsel %vm1480_vm9, %v2808_v45, %v4358_v21 }
0x3152   :  { %v2812_v61 = vsel %vm1483_vm10, %v2810_v8, %v4387_v42 }
0x3153   :  { %v2814_v50 = vsel %vm1486_vm11, %v2812_v61, %v4411_v58 }
0x31c2   :  { %v2658_v35 = vpop.permute.xlu1 %2657 }
0x31c3   :  { %3313 = vmatmul.mubr.msk.f32.vlgmr.msra.gmra.mrb[18].mxu0 %vm159_vm4, %v2658_v35  ;;  %v2811_v35 = vsel %vm1480_vm9, %v2809_v57, %v4356_v23 }
0x31c4   :  { %v2813_v41 = vsel %vm1483_vm10, %v2811_v35, %v4385_v47 }
0x31c5   :  { %v2815_v48 = vsel %vm1486_vm11, %v2813_v41, %v4409_v29 }
0x3296   :  { %v2727_v37 = vpop.f32.mrb[18].mxu0 }
0x3297   :  { %v2750_v28 = vadd.f32 %v2727_v37, %v4209_v15  ;;  %v3314_v43 = vpop.f32.mrb[19].mxu0  ;;  %v2732_v44 = vrot.slane %v2727_v37, 1  ;;  %v2733_v46 = vrot.slane %v2727_v37, 2 }
0x3299   :  { %v2752_v31 = vrot.slane %v2750_v28, 1  ;;  %v2753_v20 = vrot.slane %v2750_v28, 2  ;;  %v2736_v17 = vadd.f32 %v2732_v44, %v4222_v52  ;;  %v2737_v30 = vadd.f32 %v2733_v46, %v4220_v25 }
0x329b   :  { %2756 = vrot.lane.b32.xlu1 %v2753_v20, %s3765_s12  ;;  %2754 = vrot.lane.b32.xlu0 %v2752_v31, %s3765_s12  ;;  %v3004_v49 = vmul.f32 -1.442695, %v2736_v17  ;;  %v3005_v51 = vmul.f32 -1.442695, %v2737_v30 }
0x329d   :  { %3646 = vpow2.f32 %v3004_v49 }
0x329e   :  { %3648 = vpow2.f32 %v3005_v51 }
0x32a7   :  { %v3647_v53 = vpop.eup %3646 }
0x32a8   :  { %v3649_v54 = vpop.eup %3648  ;;  %v2744_v15 = vadd.f32 1.0, %v3647_v53 }
0x32a9   :  { %v2745_v55 = vadd.f32 1.0, %v3649_v54 }
0x32aa   :  { %3650 = vrcp.f32 %v2744_v15 }
0x32ab   :  { %3652 = vrcp.f32 %v2745_v55 }
0x32b4   :  { %v3651_v56 = vpop.eup %3650 }
0x32b5   :  { %v3653_v60 = vpop.eup %3652 }
0x330d   :  { %v2757_v62 = vpop.permute.xlu1 %2756  ;;  %v2755_v5 = vpop.permute.xlu0 %2754 }
0x330e   :  { %v2761_v18 = vmul.f32 %v3653_v60, %v2757_v62  ;;  %v2760_v63 = vmul.f32 %v3651_v56, %v2755_v5 }
0x3310   :  { %2766 = vrot.lane.b32.xlu1 %v2761_v18, %s3765_s12  ;;  %2764 = vrot.lane.b32.xlu0 %v2760_v63, %s3765_s12 }
0x3382   :  { %v2767_v6 = vpop.permute.xlu1 %2766  ;;  %v2765_v16 = vpop.permute.xlu0 %2764 }
0x3383   :  { %v2771_v0 = vadd.f32 %v2767_v6, %v4220_v25  ;;  %v2770_v1 = vadd.f32 %v2765_v16, %v4222_v52  ;;  %v2818_v25 = vld [vmem:[%s4516_s7] sm:$0xff]  ;;  %v2819_v52 = vld [vmem:[%s4516_s7 + $0x8] sm:$0xff]  ;;  %s3768_s7 = smov [#allocation8]  }
0x3384   :  { %v3442_v19 = vpack.c.bf16 %v2819_v52, %v2818_v25  ;;  %s2926_s11 = sshll.u32 %s3768_s7, 4  ;;  %s2927_s11 = int_to_ptr.vmem [resolvable:$true] %s2926_s11 }
0x3385   :  { %3654 = vtanh.f32 %v2771_v0  ;;  %s3703_s4 = scalar_lea.vmem %s2927_s11, 256  ;;  %p3708_p3 = scmp.lt.s32.totalorder %s2927_s11, %s2927_s11 }
0x3386   :  { %3656 = vtanh.f32 %v2770_v1  ;;  %3443 = vmatprep.subr.bf16.mxu1 %v3442_v19  ;;  %p3704_p2 = scmp.ne.s32.totalorder %s2927_s11, %s3703_s4  ;;  %p3709_p4 = scmp.lt.s32.totalorder %s3703_s4, %s3703_s4 }
0x3387   :  { %3445 = vmatpush3.bf16.msra.mxu1 %v3442_v19 }
0x3388   :  { %3447 = vmatprep.subr.bf16.mxu1 %v3446_v24  ;;  %p3710_p5 = por %p3709_p4, %p3708_p3 }
0x338a   :  { %p3711_p6 = pnand %p3710_p5, %p3704_p2 }
0x338b   :  { %3449 = vmatpush3.bf16.msra.mxu1 %v3446_v24 }
0x338f   :  { %v3655_v2 = vpop.eup %3654 }
0x3390   :  { %v3657_v3 = vpop.eup %3656  ;;  %v2777_v38 = vrot.slane %v3655_v2, 1 }
0x3391   :  { %v2776_v40 = vrot.slane %v3657_v3, 1 }
0x3392   :  { %v2781_v4 = vsub.f32 %v4409_v29, %v2777_v38 }
0x3393   :  { %v2780_v11 = vsub.f32 %v4411_v58, %v2776_v40 }
0x3394   :  { %v2785_v12 = vrot.slane %v2781_v4, 7 }
0x3395   :  { %v2784_v13 = vrot.slane %v2780_v11, 7 }
0x3396   :  { %2788 = vrot.lane.b32.xlu1 %v2785_v12, %s3767_s14 }
0x3397   :  { %2786 = vrot.lane.b32.xlu0 %v2784_v13, %s3767_s14 }
0x3408   :  { %v2789_v26 = vpop.permute.xlu1 %2788 }
0x3409   :  { %v2793_v27 = vmul.f32 %v3653_v60, %v2789_v26  ;;  %v2787_v32 = vpop.permute.xlu0 %2786 }
0x340a   :  { %v2792_v33 = vmul.f32 %v3651_v56, %v2787_v32 }
0x340b   :  { %2798 = vrot.lane.b32.xlu1 %v2793_v27, %s3766_s13 }
0x340c   :  { %2796 = vrot.lane.b32.xlu0 %v2792_v33, %s3766_s13 }
0x347d   :  { %v2799_v39 = vpop.permute.xlu1 %2798 }
0x347e   :  { %v2803_v7 = vadd.f32 %v3655_v2, %v2799_v39  ;;  %v2797_v59 = vpop.permute.xlu0 %2796 }
0x347f   :  { %v2802_v37 = vadd.f32 %v3657_v3, %v2797_v59 }
0x3480   :  { %v2817_v23 = vsel %vm1489_vm12, %v2815_v48, %v2803_v7 }
0x3481   :  { %2826 = vrot.lane.b32.xlu1 %v2817_v23, %s3765_s12  ;;  %v2816_v21 = vsel %vm1489_vm12, %v2814_v50, %v2802_v37 }
0x3482   :  { %2824 = vrot.lane.b32.xlu0 %v2816_v21, %s3765_s12 }
0x34f3   :  { %v2827_v47 = vpop.permute.xlu1 %2826 }
0x34f4   :  { %v2825_v28 = vpop.permute.xlu0 %2824 }
0x34f5   :  { %3323 = vmatprep.mubr.msk.f32.mxu1 %vm159_vm4, %v2825_v28 }
0x34f6   :  { %3324 = vmatmul.mubr.msk.f32.vlgmr.msra.gmra.mrb[18].mxu1 %vm159_vm4, %v2827_v47 }
0x34f7   :  { %3714 = shalt.err (!%p3711_p6)
}
0x34f8   :  { %s3715_s12 = scalar_lea.hbm %s4518_s9, 256 }
0x34f9   :  { %p3716_p7 = scmp.ne.s32.totalorder %s4518_s9, %s3715_s12  ;;  %p3719_p8 = scmp.lt.u32.totalorder %s3715_s12, %s4518_s9 }
0x34fb   :  { %p3721_p9 = pnand %p3719_p8, %p3716_p7 }
0x34fd   :  { %3724 = shalt.err (!%p3721_p9)
}
0x34fe   :  { %2932 = dma.vmem_to_hbm [thread:$0]  %s2927_s11, 256, %s4518_s9, [#allocation9], %s3756_s19, %s3756_s19, %s3757_s20  }
0x34ff   :  { %s3769_s22 = smov [#allocation7]  }
0x3500   :  { %s2914_s6 = sshll.u32 %s3769_s22, 4  ;;  %s2915_s6 = int_to_ptr.vmem [resolvable:$true] %s2914_s6 }
0x3501   :  { %s3725_s23 = scalar_lea.vmem %s2915_s6, 256  ;;  %p3730_p11 = scmp.lt.s32.totalorder %s2915_s6, %s2915_s6 }
0x3502   :  { %p3726_p10 = scmp.ne.s32.totalorder %s2915_s6, %s3725_s23  ;;  %p3731_p12 = scmp.lt.s32.totalorder %s3725_s23, %s3725_s23 }
0x3504   :  { %p3732_p13 = por %p3731_p12, %p3730_p11 }
0x3506   :  { %p3733_p0 = pnand %p3732_p13, %p3726_p10 }
0x35c9   :  { %v3325_v42 = vpop.f32.mrb[18].mxu1 }
0x35ca   :  { %2908 = vst.msk [vmem:[#allocation7 + $0x8] sm:$0xff] %vm77_vm0, %v3325_v42  ;;  %v2898_v29 = vpop.f32.mrb[19].mxu1 }
0x35cb   :  { %2907 = vst.msk [vmem:[#allocation7] sm:$0xff] %vm77_vm0, %v2898_v29 }
0x35cc   :  { %3736 = shalt.err (!%p3733_p0)
}
0x35cd   :  { %s3737_s9 = scalar_lea.hbm %s4517_s8, 256 }
0x35ce   :  { %p3738_p1 = scmp.ne.s32.totalorder %s4517_s8, %s3737_s9  ;;  %p3741_p2 = scmp.lt.u32.totalorder %s3737_s9, %s4517_s8 }
0x35d0   :  { %p3743_p3 = pnand %p3741_p2, %p3738_p1 }
0x35d2   :  { %3746 = shalt.err (!%p3743_p3)
}
0x35d3   :  { %2920 = dma.vmem_to_hbm [thread:$0]  %s2915_s6, 256, %s4517_s8, [#allocation4], %s3756_s19, %s3756_s19, %s3757_s20  }
0x35d4   :  { %3751 = dma.done.wait [#allocation4], 256  }
0x35d5   :  { %3752 = vsyncadd [#allocation4], 4294967040 }
0x35d6   :  { %3753 = dma.done.wait [#allocation9], 256  }
0x35d7   :  { %3754 = vsyncadd [#allocation9], 4294967040 }
0x35d8   :  { %2939 = vsyncpa [#allocation3], 1 }
0x35d9   :  { %2940 = vsyncpa [#allocation6], 1 }
0x35da   :  { %2941 = vsyncpa [#allocation4], 1 }
0x35db   :  { %2942 = vsyncpa [#allocation9], 1 }

</bundles_post_ra>
